<compile_context>
chip_gen: v7x
topology: tpu7x:2x2x1
jax: 0.10.0
libtpu: 0.0.40
codegen_flags: <defaults>
</compile_context>

<pallas_src>
import functools

import jax
import jax.numpy as jnp
from jax import lax
from jax.experimental import pallas as pl
from jax.experimental.pallas import tpu as pltpu


_LANE = 128              # lane width: output channels padded to a multiple of this
_TM_MIN_SPLIT = 64       # don't split M into tiles smaller than this
_TK_MAX = 1024           # cap on a K tile when K must be split


def _round_up(x, m):
    return ((x + m - 1) // m) * m


@functools.lru_cache(maxsize=None)
def _hw_plan():
    """(tm_max, tile_budget_bytes, vmem_limit_bytes) derived from the chip.

    v5e/v6e have 128 MiB VMEM per TensorCore -> larger M tiles; v7x has
    64 MiB -> keep the scoped limit well under it (review guidance: <=48 MiB).
    """
    try:
        vmem = int(pltpu.get_tpu_info().vmem_capacity_bytes)
    except Exception:
        vmem = 64 * 1024 * 1024            # unknown -> assume the small (v7x) VMEM
    if vmem >= 128 * 1024 * 1024:          # v5e / v6e
        return 1024, 80 * 1024 * 1024, 100 * 1024 * 1024
    return 512, 40 * 1024 * 1024, 48 * 1024 * 1024


def _choose_tm(m, tm_max):
    """M tile: divide M exactly (avoids a jnp.pad copy of the patch tensor) and
    leave >= 2 tiles so the 'parallel' M axis can shard across v7x's two TCs."""
    upper = min(tm_max, m // 2)
    upper -= upper % 8
    for t in range(upper, _TM_MIN_SPLIT - 1, -8):
        if m % t == 0:
            return t, m
    if m <= tm_max:
        return m, m                          # one full-dim tile, no padding
    return tm_max, _round_up(m, tm_max)      # rare: ragged M edge -> pad


def _tile_plan(m, k, n_pad, tm_max, tile_budget):
    """Returns (tm, m_pad, tk, k_pad, tn)."""
    tn = 256 if n_pad % 256 == 0 else _LANE
    tm, m_pad = _choose_tm(m, tm_max)

    def fits(tm_, tk_, out_bytes):
        vmem = (2 * tm_ * tk_ * 2            # patches (bf16, double-buffered)
                + 2 * tk_ * tn * 2           # weights (bf16, double-buffered)
                + 2 * tn * 4                 # folded BN shift
                + 2 * tm_ * tn * out_bytes)  # output block
        return vmem <= tile_budget

    # Preferred: one full-K tile -> no K padding, no accumulation pass, and the
    # weight block index no longer changes every grid step.  Shrink tm (never
    # tn) while it stays a divisor of the padded M.
    t = tm
    while True:
        if fits(t, k, 2):
            return t, m_pad, k, k, tn
        half = t // 2
        if half >= 16 and half % 8 == 0 and m_pad % half == 0:
            t = half
        else:
            break

    # Fallback: split K.  tk is a multiple of 128 chosen to minimise K padding
    # (round_up(K, 128) rather than round_up(K, tk_max)).
    best = None
    for tk in range(_LANE, _TK_MAX + 1, _LANE):
        if not fits(tm, tk, 4):
            continue
        k_pad = _round_up(k, tk)
        key = (k_pad, -tk)                   # least padding, then biggest tile
        if best is None or key < best[0]:
            best = (key, tk, k_pad)
    if best is None:
        tk, k_pad = _LANE, _round_up(k, _LANE)
    else:
        _, tk, k_pad = best
    return tm, m_pad, tk, k_pad, tn


# ----------------------------------------------------------------------------
# Pallas kernels: im2col-matmul conv + folded-BN shift + ReLU
# ----------------------------------------------------------------------------
def _conv_bn_relu_kernel_1k(p_ref, w_ref, shift_ref, o_ref):
    """Single-pass variant (whole K in one tile): dot, +shift, ReLU, bf16 store.
    No scratch accumulator, no pl.when branches."""
    y = jnp.dot(p_ref[...], w_ref[...], preferred_element_type=jnp.float32)
    o_ref[...] = jnp.maximum(y + shift_ref[...], 0.0).astype(o_ref.dtype)


def _conv_bn_relu_kernel_mk(p_ref, w_ref, shift_ref, o_ref):
    """Split-K variant: accumulate directly into the resident f32 output block
    (its block index is constant across k); epilogue at the last k step."""
    k = pl.program_id(2)

    @pl.when(k == 0)
    def _():
        o_ref[...] = jnp.zeros_like(o_ref)

    o_ref[...] += jnp.dot(p_ref[...], w_ref[...],
                          preferred_element_type=jnp.float32)

    @pl.when(k == pl.num_programs(2) - 1)
    def _():
        o_ref[...] = jnp.maximum(o_ref[...] + shift_ref[...], 0.0)


def _fused_conv_bn_relu_matmul(patches, w2d, shift2d, tm, tk, tn, vmem_limit):
    m, k_dim = patches.shape
    n = w2d.shape[1]
    m_tiles, n_tiles = m // tm, n // tn

    if tk == k_dim:                                    # single full-K tile
        return pl.pallas_call(
            _conv_bn_relu_kernel_1k,
            out_shape=jax.ShapeDtypeStruct((m, n), jnp.bfloat16),
            grid=(m_tiles, n_tiles),
            in_specs=[
                pl.BlockSpec((tm, k_dim), lambda i, j: (i, 0)),
                pl.BlockSpec((k_dim, tn), lambda i, j: (0, j)),
                pl.BlockSpec((1, tn), lambda i, j: (0, j)),
            ],
            out_specs=pl.BlockSpec((tm, tn), lambda i, j: (i, j)),
            compiler_params=pltpu.CompilerParams(
                dimension_semantics=("parallel", "parallel"),
                vmem_limit_bytes=vmem_limit),
        )(patches, w2d, shift2d)

    k_tiles = k_dim // tk
    out = pl.pallas_call(
        _conv_bn_relu_kernel_mk,
        out_shape=jax.ShapeDtypeStruct((m, n), jnp.float32),
        grid=(m_tiles, n_tiles, k_tiles),
        in_specs=[
            pl.BlockSpec((tm, tk), lambda i, j, k: (i, k)),
            pl.BlockSpec((tk, tn), lambda i, j, k: (k, j)),
            pl.BlockSpec((1, tn), lambda i, j, k: (0, j)),
        ],
        out_specs=pl.BlockSpec((tm, tn), lambda i, j, k: (i, j)),
        compiler_params=pltpu.CompilerParams(
            dimension_semantics=("parallel", "parallel", "arbitrary"),
            vmem_limit_bytes=vmem_limit),
    )(patches, w2d, shift2d)
    return out.astype(jnp.bfloat16)


# ----------------------------------------------------------------------------
# One stage: 3x3 conv (no bias, stride 2, pad 1) + BN(eval) + ReLU, NHWC bf16
# ----------------------------------------------------------------------------
def _conv_bn_relu(x_nhwc_bf16, params, stride=2, pad=1):
    """Input may carry lane-padding channels (exact zeros) from the previous
    stage; those get zero weight rows.  Returns a lane-padded bf16 NHWC tensor
    whose padded output channels are exact zeros (zero weight columns + zero
    shift -> ReLU(0) = 0), plus the real channel count."""
    w = params["w"]                                     # (Cout, Cin, KH, KW)
    gamma, beta = params["gamma"], params["beta"]
    mean, var = params["mean"], params["var"]
    eps = 1e-5

    Cout, Cin_w, KH, KW = w.shape
    N = x_nhwc_bf16.shape[0]
    Cin_x = x_nhwc_bf16.shape[-1]                       # >= Cin_w (maybe padded)

    # Fold BN: scale into the conv weights; only the shift goes to the kernel.
    scale = gamma / jnp.sqrt(var + eps)                 # (Cout,)
    shift = (beta - mean * scale).astype(jnp.float32)   # (Cout,)
    # conv_general_dilated_patches feature index = c*(KH*KW) + kh*KW + kw
    # (channel-major); weight rows are laid out identically.
    w2d = (jnp.transpose(w, (1, 2, 3, 0)).reshape(Cin_w * KH * KW, Cout)
           * scale[None, :])

    # Patch extraction as a single fused XLA op, in bf16.
    # TODO(synk): form patches inside the kernel (halo'd blocks / manual DMA)
    # so the K-expanded patch tensor is never materialized in HBM.
    patches = lax.conv_general_dilated_patches(
        x_nhwc_bf16,
        filter_shape=(KH, KW),
        window_strides=(stride, stride),
        padding=((pad, pad), (pad, pad)),
        dimension_numbers=("NHWC", "HWIO", "NHWC"),
    )                                                   # (N, OH, OW, Cin_x*KH*KW)
    OH, OW = patches.shape[1], patches.shape[2]
    K = Cin_x * KH * KW
    M = N * OH * OW
    patches = patches.reshape(M, K)

    cout_pad = _round_up(Cout, _LANE)
    tm_max, tile_budget, vmem_limit = _hw_plan()
    tm, m_pad, tk, k_pad, tn = _tile_plan(M, K, cout_pad, tm_max, tile_budget)

    # Weight rows: real Cin rows, then zero rows for lane-padded input channels
    # and any K-tiling padding (channel-major -> all appended at the end).
    w2d = jnp.pad(w2d, ((0, k_pad - Cin_w * KH * KW), (0, cout_pad - Cout)))
    w2d = w2d.astype(jnp.bfloat16)
    shift2d = jnp.pad(shift.reshape(1, Cout), ((0, 0), (0, cout_pad - Cout)))

    if m_pad != M or k_pad != K:                        # rare ragged-edge path
        patches = jnp.pad(patches, ((0, m_pad - M), (0, k_pad - K)))

    out = _fused_conv_bn_relu_matmul(patches, w2d, shift2d, tm, tk, tn,
                                     vmem_limit)        # (m_pad, cout_pad) bf16
    out = out[:M].reshape(N, OH, OW, cout_pad)
    return out, Cout


# ----------------------------------------------------------------------------
# "TIMMBackbone" synthetic parameters + forward
# ----------------------------------------------------------------------------
def init_params(in_channels=3, widths=(16, 32, 64, 128), key=None):
    if key is None:
        key = jax.random.PRNGKey(0)
    params = []
    cin = in_channels
    for cout in widths:
        key, kw_, kg, kb, km, kv = jax.random.split(key, 6)
        params.append({
            "w": 0.1 * jax.random.normal(kw_, (cout, cin, 3, 3), jnp.float32),
            "gamma": 1.0 + 0.05 * jax.random.normal(kg, (cout,), jnp.float32),
            "beta": 0.05 * jax.random.normal(kb, (cout,), jnp.float32),
            "mean": 0.05 * jax.random.normal(km, (cout,), jnp.float32),
            "var": jnp.abs(1.0 + 0.05 * jax.random.normal(kv, (cout,), jnp.float32)),
        })
        cin = cout
    return params


@jax.jit
def timm_backbone_forward(x_nchw, params_list):
    """Mimics TIMMBackbone.forward: NCHW in, list of NCHW feature maps out."""
    # TODO(synk): arbitrary pretrained timm architectures (SE, attention, ...)
    # are not reproducible without the checkpoint; this implements the
    # canonical conv-BN-ReLU multi-scale extractor matching features_only=True.
    # TODO(synk): at small resolutions the stages could be fused into a single
    # pallas_call with the activation resident in VMEM (per-call overhead
    # dominates at the demo sizes).
    h = jnp.transpose(x_nchw, (0, 2, 3, 1)).astype(jnp.bfloat16)   # NCHW->NHWC
    features = []
    for p in params_list:
        h_pad, cout = _conv_bn_relu(h, p, stride=2, pad=1)
        features.append(
            jnp.transpose(h_pad[..., :cout].astype(jnp.float32), (0, 3, 1, 2)))
        # Carry the lane-padded bf16 activation when the padding overhead is
        # small (real timm widths are multiples of 128 -> zero overhead);
        # otherwise slice so the next stage's im2col K isn't inflated.
        h = h_pad if h_pad.shape[-1] * 4 <= cout * 5 else h_pad[..., :cout]
    return features


# ----------------------------------------------------------------------------
# Pure-JAX f32 reference for numerical validation
# ----------------------------------------------------------------------------
def _reference_forward(x_nchw, params_list):
    eps = 1e-5
    h = jnp.transpose(x_nchw, (0, 2, 3, 1)).astype(jnp.float32)
    feats = []
    for p in params_list:
        w_hwio = jnp.transpose(p["w"], (2, 3, 1, 0))
        y = lax.conv_general_dilated(
            h, w_hwio, (2, 2), ((1, 1), (1, 1)),
            dimension_numbers=("NHWC", "HWIO", "NHWC"))
        scale = p["gamma"] / jnp.sqrt(p["var"] + eps)
        y = y * scale + (p["beta"] - p["mean"] * scale)
        h = jnp.maximum(y, 0.0)
        feats.append(jnp.transpose(h, (0, 3, 1, 2)))
    return feats


if __name__ == "__main__":
    key = jax.random.PRNGKey(0)
    kx, kp = jax.random.split(key)
    # small shapes consistent with the module: batch=2, in_channels=3, 16x16
    x = jax.random.normal(kx, (2, 3, 16, 16), jnp.float32)
    params = init_params(in_channels=3, widths=(16, 32, 64, 128), key=kp)

    feats = timm_backbone_forward(x, params)
    feats = [jax.block_until_ready(f) for f in feats]

    expected = [(2, 16, 8, 8), (2, 32, 4, 4), (2, 64, 2, 2), (2, 128, 1, 1)]
    assert [tuple(f.shape) for f in feats] == expected, \
        [tuple(f.shape) for f in feats]
    assert all(bool(jnp.all(jnp.isfinite(f))) for f in feats)

    # numerical check against full-precision reference (kernel path uses bf16
    # activations/weights with f32 accumulation -> loose tolerance)
    refs = _reference_forward(x, params)
    for f, r in zip(feats, refs):
        err = float(jnp.max(jnp.abs(f - r)))
        denom = max(1.0, float(jnp.max(jnp.abs(r))))
        assert err / denom < 8e-2, (err, denom)

    print("KERNEL_OK")
</pallas_src>

<mosaic_0001>
module attributes {stable_mosaic.version = 11 : i64} {
  func.func @_conv_bn_relu_kernel_1k(%arg0: i32, %arg1: i32, %arg2: memref<64x27xbf16, #tpu.memory_space<vmem>>, %arg3: memref<27x128xbf16, #tpu.memory_space<vmem>>, %arg4: memref<1x128xf32, #tpu.memory_space<vmem>>, %arg5: memref<64x128xbf16, #tpu.memory_space<vmem>>) attributes {dimension_semantics = [#tpu.dimension_semantics<parallel>, #tpu.dimension_semantics<parallel>], iteration_bounds = array<i64: 2, 1>, scalar_prefetch = 0 : i64, scratch_operands = 0 : i64, tpu.core_type = #tpu.core_type<tc>, window_params = [{transform_indices = @transform_0, window_bounds = array<i64: 64, 27>}, {transform_indices = @transform_1, window_bounds = array<i64: 27, 128>}, {transform_indices = @transform_2, window_bounds = array<i64: 1, 128>}, {transform_indices = @transform_3, window_bounds = array<i64: 64, 128>}]} {
    %c0 = arith.constant 0 : index
    %c0_0 = arith.constant 0 : index
    %0 = vector.load %arg2[%c0, %c0_0] : memref<64x27xbf16, #tpu.memory_space<vmem>>, vector<64x27xbf16>
    %c0_1 = arith.constant 0 : index
    %c0_2 = arith.constant 0 : index
    %1 = vector.load %arg3[%c0_1, %c0_2] : memref<27x128xbf16, #tpu.memory_space<vmem>>, vector<27x128xbf16>
    %cst = arith.constant dense<0.000000e+00> : vector<64x128xf32>
    %2 = tpu.matmul %0, %1, %cst {dimension_numbers = #tpu.dot_dimension_numbers<[1], [0], [0], [1], [0, 0, 1, 1], [], []>} : vector<64x27xbf16>, vector<27x128xbf16>, vector<64x128xf32> -> vector<64x128xf32>
    %c0_3 = arith.constant 0 : index
    %c0_4 = arith.constant 0 : index
    %3 = vector.load %arg4[%c0_3, %c0_4] : memref<1x128xf32, #tpu.memory_space<vmem>>, vector<1x128xf32>
    %4 = vector.broadcast %3 : vector<1x128xf32> to vector<64x128xf32>
    %5 = arith.addf %2, %4 : vector<64x128xf32>
    %cst_5 = arith.constant 0.000000e+00 : f32
    %6 = vector.broadcast %cst_5 : f32 to vector<64x128xf32>
    %7 = arith.maximumf %5, %6 : vector<64x128xf32>
    %8 = arith.truncf %7 : vector<64x128xf32> to vector<64x128xbf16>
    %c0_6 = arith.constant 0 : index
    %c0_7 = arith.constant 0 : index
    %9 = vector.load %arg5[%c0_6, %c0_7] : memref<64x128xbf16, #tpu.memory_space<vmem>>, vector<64x128xbf16>
    tpu.vector_store %arg5[%c0_6, %c0_7], %8 {strides = array<i32>} : memref<64x128xbf16, #tpu.memory_space<vmem>>, vector<64x128xbf16>,
    return
  }
  func.func @transform_0(%arg0: i32, %arg1: i32) -> (i32, i32) {
    %c0_i32 = arith.constant 0 : i32
    %c0_i32_0 = arith.constant 0 : i32
    return %arg0, %c0_i32 : i32, i32
  }
  func.func @transform_1(%arg0: i32, %arg1: i32) -> (i32, i32) {
    %c0_i32 = arith.constant 0 : i32
    %c0_i32_0 = arith.constant 0 : i32
    return %c0_i32, %arg1 : i32, i32
  }
  func.func @transform_2(%arg0: i32, %arg1: i32) -> (i32, i32) {
    %c0_i32 = arith.constant 0 : i32
    %c0_i32_0 = arith.constant 0 : i32
    return %c0_i32, %arg1 : i32, i32
  }
  func.func @transform_3(%arg0: i32, %arg1: i32) -> (i32, i32) {
    %c0_i32 = arith.constant 0 : i32
    return %arg0, %arg1 : i32, i32
  }
}

module attributes {stable_mosaic.version = 11 : i64} {
  func.func @_conv_bn_relu_kernel_1k(%arg0: i32, %arg1: i32, %arg2: memref<32x144xbf16, #tpu.memory_space<vmem>>, %arg3: memref<144x128xbf16, #tpu.memory_space<vmem>>, %arg4: memref<1x128xf32, #tpu.memory_space<vmem>>, %arg5: memref<32x128xbf16, #tpu.memory_space<vmem>>) attributes {dimension_semantics = [#tpu.dimension_semantics<parallel>, #tpu.dimension_semantics<parallel>], iteration_bounds = array<i64: 1, 1>, scalar_prefetch = 0 : i64, scratch_operands = 0 : i64, tpu.core_type = #tpu.core_type<tc>, window_params = [{transform_indices = @transform_0, window_bounds = array<i64: 32, 144>}, {transform_indices = @transform_1, window_bounds = array<i64: 144, 128>}, {transform_indices = @transform_2, window_bounds = array<i64: 1, 128>}, {transform_indices = @transform_3, window_bounds = array<i64: 32, 128>}]} {
    %c0 = arith.constant 0 : index
    %c0_0 = arith.constant 0 : index
    %0 = vector.load %arg2[%c0, %c0_0] : memref<32x144xbf16, #tpu.memory_space<vmem>>, vector<32x144xbf16>
    %c0_1 = arith.constant 0 : index
    %c0_2 = arith.constant 0 : index
    %1 = vector.load %arg3[%c0_1, %c0_2] : memref<144x128xbf16, #tpu.memory_space<vmem>>, vector<144x128xbf16>
    %cst = arith.constant dense<0.000000e+00> : vector<32x128xf32>
    %2 = tpu.matmul %0, %1, %cst {dimension_numbers = #tpu.dot_dimension_numbers<[1], [0], [0], [1], [0, 0, 1, 1], [], []>} : vector<32x144xbf16>, vector<144x128xbf16>, vector<32x128xf32> -> vector<32x128xf32>
    %c0_3 = arith.constant 0 : index
    %c0_4 = arith.constant 0 : index
    %3 = vector.load %arg4[%c0_3, %c0_4] : memref<1x128xf32, #tpu.memory_space<vmem>>, vector<1x128xf32>
    %4 = vector.broadcast %3 : vector<1x128xf32> to vector<32x128xf32>
    %5 = arith.addf %2, %4 : vector<32x128xf32>
    %cst_5 = arith.constant 0.000000e+00 : f32
    %6 = vector.broadcast %cst_5 : f32 to vector<32x128xf32>
    %7 = arith.maximumf %5, %6 : vector<32x128xf32>
    %8 = arith.truncf %7 : vector<32x128xf32> to vector<32x128xbf16>
    %c0_6 = arith.constant 0 : index
    %c0_7 = arith.constant 0 : index
    %9 = vector.load %arg5[%c0_6, %c0_7] : memref<32x128xbf16, #tpu.memory_space<vmem>>, vector<32x128xbf16>
    tpu.vector_store %arg5[%c0_6, %c0_7], %8 {strides = array<i32>} : memref<32x128xbf16, #tpu.memory_space<vmem>>, vector<32x128xbf16>,
    return
  }
  func.func @transform_0(%arg0: i32, %arg1: i32) -> (i32, i32) {
    %c0_i32 = arith.constant 0 : i32
    %c0_i32_0 = arith.constant 0 : i32
    return %arg0, %c0_i32 : i32, i32
  }
  func.func @transform_1(%arg0: i32, %arg1: i32) -> (i32, i32) {
    %c0_i32 = arith.constant 0 : i32
    %c0_i32_0 = arith.constant 0 : i32
    return %c0_i32, %arg1 : i32, i32
  }
  func.func @transform_2(%arg0: i32, %arg1: i32) -> (i32, i32) {
    %c0_i32 = arith.constant 0 : i32
    %c0_i32_0 = arith.constant 0 : i32
    return %c0_i32, %arg1 : i32, i32
  }
  func.func @transform_3(%arg0: i32, %arg1: i32) -> (i32, i32) {
    %c0_i32 = arith.constant 0 : i32
    return %arg0, %arg1 : i32, i32
  }
}

module attributes {stable_mosaic.version = 11 : i64} {
  func.func @_conv_bn_relu_kernel_1k(%arg0: i32, %arg1: i32, %arg2: memref<8x288xbf16, #tpu.memory_space<vmem>>, %arg3: memref<288x128xbf16, #tpu.memory_space<vmem>>, %arg4: memref<1x128xf32, #tpu.memory_space<vmem>>, %arg5: memref<8x128xbf16, #tpu.memory_space<vmem>>) attributes {dimension_semantics = [#tpu.dimension_semantics<parallel>, #tpu.dimension_semantics<parallel>], iteration_bounds = array<i64: 1, 1>, scalar_prefetch = 0 : i64, scratch_operands = 0 : i64, tpu.core_type = #tpu.core_type<tc>, window_params = [{transform_indices = @transform_0, window_bounds = array<i64: 8, 288>}, {transform_indices = @transform_1, window_bounds = array<i64: 288, 128>}, {transform_indices = @transform_2, window_bounds = array<i64: 1, 128>}, {transform_indices = @transform_3, window_bounds = array<i64: 8, 128>}]} {
    %c0 = arith.constant 0 : index
    %c0_0 = arith.constant 0 : index
    %0 = vector.load %arg2[%c0, %c0_0] : memref<8x288xbf16, #tpu.memory_space<vmem>>, vector<8x288xbf16>
    %c0_1 = arith.constant 0 : index
    %c0_2 = arith.constant 0 : index
    %1 = vector.load %arg3[%c0_1, %c0_2] : memref<288x128xbf16, #tpu.memory_space<vmem>>, vector<288x128xbf16>
    %cst = arith.constant dense<0.000000e+00> : vector<8x128xf32>
    %2 = tpu.matmul %0, %1, %cst {dimension_numbers = #tpu.dot_dimension_numbers<[1], [0], [0], [1], [0, 0, 1, 1], [], []>} : vector<8x288xbf16>, vector<288x128xbf16>, vector<8x128xf32> -> vector<8x128xf32>
    %c0_3 = arith.constant 0 : index
    %c0_4 = arith.constant 0 : index
    %3 = vector.load %arg4[%c0_3, %c0_4] : memref<1x128xf32, #tpu.memory_space<vmem>>, vector<1x128xf32>
    %4 = vector.broadcast %3 : vector<1x128xf32> to vector<8x128xf32>
    %5 = arith.addf %2, %4 : vector<8x128xf32>
    %cst_5 = arith.constant 0.000000e+00 : f32
    %6 = vector.broadcast %cst_5 : f32 to vector<8x128xf32>
    %7 = arith.maximumf %5, %6 : vector<8x128xf32>
    %8 = arith.truncf %7 : vector<8x128xf32> to vector<8x128xbf16>
    %c0_6 = arith.constant 0 : index
    %c0_7 = arith.constant 0 : index
    %9 = vector.load %arg5[%c0_6, %c0_7] : memref<8x128xbf16, #tpu.memory_space<vmem>>, vector<8x128xbf16>
    tpu.vector_store %arg5[%c0_6, %c0_7], %8 {strides = array<i32>} : memref<8x128xbf16, #tpu.memory_space<vmem>>, vector<8x128xbf16>,
    return
  }
  func.func @transform_0(%arg0: i32, %arg1: i32) -> (i32, i32) {
    %c0_i32 = arith.constant 0 : i32
    %c0_i32_0 = arith.constant 0 : i32
    return %arg0, %c0_i32 : i32, i32
  }
  func.func @transform_1(%arg0: i32, %arg1: i32) -> (i32, i32) {
    %c0_i32 = arith.constant 0 : i32
    %c0_i32_0 = arith.constant 0 : i32
    return %c0_i32, %arg1 : i32, i32
  }
  func.func @transform_2(%arg0: i32, %arg1: i32) -> (i32, i32) {
    %c0_i32 = arith.constant 0 : i32
    %c0_i32_0 = arith.constant 0 : i32
    return %c0_i32, %arg1 : i32, i32
  }
  func.func @transform_3(%arg0: i32, %arg1: i32) -> (i32, i32) {
    %c0_i32 = arith.constant 0 : i32
    return %arg0, %arg1 : i32, i32
  }
}

module attributes {stable_mosaic.version = 11 : i64} {
  func.func @_conv_bn_relu_kernel_1k(%arg0: i32, %arg1: i32, %arg2: memref<2x576xbf16, #tpu.memory_space<vmem>>, %arg3: memref<576x128xbf16, #tpu.memory_space<vmem>>, %arg4: memref<1x128xf32, #tpu.memory_space<vmem>>, %arg5: memref<2x128xbf16, #tpu.memory_space<vmem>>) attributes {dimension_semantics = [#tpu.dimension_semantics<parallel>, #tpu.dimension_semantics<parallel>], iteration_bounds = array<i64: 1, 1>, scalar_prefetch = 0 : i64, scratch_operands = 0 : i64, tpu.core_type = #tpu.core_type<tc>, window_params = [{transform_indices = @transform_0, window_bounds = array<i64: 2, 576>}, {transform_indices = @transform_1, window_bounds = array<i64: 576, 128>}, {transform_indices = @transform_2, window_bounds = array<i64: 1, 128>}, {transform_indices = @transform_3, window_bounds = array<i64: 2, 128>}]} {
    %c0 = arith.constant 0 : index
    %c0_0 = arith.constant 0 : index
    %0 = vector.load %arg2[%c0, %c0_0] : memref<2x576xbf16, #tpu.memory_space<vmem>>, vector<2x576xbf16>
    %c0_1 = arith.constant 0 : index
    %c0_2 = arith.constant 0 : index
    %1 = vector.load %arg3[%c0_1, %c0_2] : memref<576x128xbf16, #tpu.memory_space<vmem>>, vector<576x128xbf16>
    %cst = arith.constant dense<0.000000e+00> : vector<2x128xf32>
    %2 = tpu.matmul %0, %1, %cst {dimension_numbers = #tpu.dot_dimension_numbers<[1], [0], [0], [1], [0, 0, 1, 1], [], []>} : vector<2x576xbf16>, vector<576x128xbf16>, vector<2x128xf32> -> vector<2x128xf32>
    %c0_3 = arith.constant 0 : index
    %c0_4 = arith.constant 0 : index
    %3 = vector.load %arg4[%c0_3, %c0_4] : memref<1x128xf32, #tpu.memory_space<vmem>>, vector<1x128xf32>
    %4 = vector.broadcast %3 : vector<1x128xf32> to vector<2x128xf32>
    %5 = arith.addf %2, %4 : vector<2x128xf32>
    %cst_5 = arith.constant 0.000000e+00 : f32
    %6 = vector.broadcast %cst_5 : f32 to vector<2x128xf32>
    %7 = arith.maximumf %5, %6 : vector<2x128xf32>
    %8 = arith.truncf %7 : vector<2x128xf32> to vector<2x128xbf16>
    %c0_6 = arith.constant 0 : index
    %c0_7 = arith.constant 0 : index
    %9 = vector.load %arg5[%c0_6, %c0_7] : memref<2x128xbf16, #tpu.memory_space<vmem>>, vector<2x128xbf16>
    tpu.vector_store %arg5[%c0_6, %c0_7], %8 {strides = array<i32>} : memref<2x128xbf16, #tpu.memory_space<vmem>>, vector<2x128xbf16>,
    return
  }
  func.func @transform_0(%arg0: i32, %arg1: i32) -> (i32, i32) {
    %c0_i32 = arith.constant 0 : i32
    %c0_i32_0 = arith.constant 0 : i32
    return %arg0, %c0_i32 : i32, i32
  }
  func.func @transform_1(%arg0: i32, %arg1: i32) -> (i32, i32) {
    %c0_i32 = arith.constant 0 : i32
    %c0_i32_0 = arith.constant 0 : i32
    return %c0_i32, %arg1 : i32, i32
  }
  func.func @transform_2(%arg0: i32, %arg1: i32) -> (i32, i32) {
    %c0_i32 = arith.constant 0 : i32
    %c0_i32_0 = arith.constant 0 : i32
    return %c0_i32, %arg1 : i32, i32
  }
  func.func @transform_3(%arg0: i32, %arg1: i32) -> (i32, i32) {
    %c0_i32 = arith.constant 0 : i32
    return %arg0, %arg1 : i32, i32
  }
}

</mosaic_0001>

<bundles_post_ra>
// kernel: timm_backbone_forward.4
= control target key start
LH: loop header
LB: loop body
LE: loop exit
PB: predicated region body
PF: predicated region fallthrough
CT: control target
= control target key end

     0   :  { %s672_s12 = smov 0   ;;  %s674_s13 = smov 0   ;;  %s721_s0 = inlined_call_operand.vmem [shape: bf16[128,27], index: 0, kind: input, shape index: {}]   ;;  %s722_s1 = inlined_call_operand.vmem [shape: bf16[27,128], index: 1, kind: input, shape index: {}]   ;;  %s723_s2 = inlined_call_operand.vmem [shape: f32[1,128], index: 2, kind: input, shape index: {}]   ;;  %s724_s3 = inlined_call_operand.vmem [shape: bf16[128,128], index: 3, kind: output, shape index: {}]  }
   0x1   :  { %s676_s14 = smov 0  }
   0x2 LB: > { %s25_s15 = sadd.s32 1, %s645_s13  ;;  %p517_p0 = scmp.ge.s32.totalorder %s649_s14, 1  ;;  %s649_s14 = sphi %s676_s14, %s13_s14   ;;  %s645_s13 = sphi %s674_s13, %s726_s13   ;;  %s641_s12 = sphi %s672_s12, %s725_s12  }
   0x3   : > { %p27_p1 = scmp.ge.s32.totalorder %s25_s15, 2  ;;  %p169_p2 = scmp.lt.s32.totalorder %s649_s14, 3 }
   0x5   : > { %s728_s15 = smov (%p27_p1, %s25_s15), 0  ;;  %p170_p3 = pnand %p517_p0, %p169_p2 }
   0x6   : > { %v621_v0 = vld [vmem:[%s722_s1] sm:$0xff] (!%p170_p3)   ;;  %vm289_vm0 = vcmask (!%p170_p3), 1044480   ;;  %v622_v1 = vld [vmem:[%s722_s1 + $0x8] sm:$0x3f] (!%p170_p3)   ;;  %vm290_vm1 = vcmask (!%p170_p3), 1045504   ;;  %s518_s20 = sshll.u32 (!%p170_p3), %s641_s12, 3 }
   0x7   : > { %173 = sbr.rel (%p170_p3) target bundleno = 241 (0xf1), region = 32  ;;  %580 = vmatprep.subr.bf16.mxu0 (!%p170_p3), %v621_v0  ;;  %592 = vmatprep.subr.bf16.mxu1 (!%p170_p3), %v621_v0  ;;  %v651_v2 = vmov (!%p170_p3), 65535   ;;  %p204_p4 = scmp.lt.s32.totalorder (!%p170_p3), %s518_s20, 15  ;;  %vm276_vm2 = vcmask (!%p170_p3), 220160   ;;  %v522_v10 = vld [vmem:[%s723_s2] ss:$0 sm:$0xff] (!%p170_p3) }
   0x8   : > { %581 = vmatpush3.bf16.msra.mxu0 (!%p170_p3), %v621_v0  ;;  %594 = vmatpush3.bf16.msra.mxu1 (!%p170_p3), %v621_v0  ;;  %v291_v3 = vsel (!%p170_p3), %vm289_vm0, 4294967295, %v651_v2 }
   0x9   : > { %v292_v4 = vsel (!%p170_p3), %vm290_vm1, %v291_v3, 0 }
   0xa   : > { %v294_v5 = vand.u32 (!%p170_p3), %v622_v1, %v292_v4 }
   0xc   : > { %582 = vmatprep.subr.bf16.mxu0 (!%p170_p3), %v294_v5  ;;  %593 = vmatprep.subr.bf16.mxu1 (!%p170_p3), %v294_v5 }
   0xd   : > { %583 = vmatpush3.bf16.msra.mxu0 (!%p170_p3), %v294_v5  ;;  %595 = vmatpush3.bf16.msra.mxu1 (!%p170_p3), %v294_v5 }
   0xe   : > { %s730_s20 = smov (!%p204_p4, %s518_s20), 15 }
   0xf   : > { %s519_s21 = sshll.u32 %s730_s20, 2 }
  0x10   : > { %s207_s24 = scalar_lea.vmem %s721_s0, %s519_s21  ;;  %s223_s29 = scalar_lea.vmem %s724_s3, %s519_s21 }
  0x11   : > { %v623_v6 = vld [vmem:[%s207_s24] sm:$0xff]   ;;  %v624_v7 = vld [vmem:[%s207_s24 + $0x10] sm:$0xff]   ;;  %v625_v8 = vld [vmem:[%s207_s24 + $0x8] sm:$0xff]  }
  0x12   : > { %584 = vmatprep.mubr.msk.bf16.mxu0 %vm276_vm2, %v623_v6  ;;  %588 = vmatprep.mubr.msk.bf16.mxu1 %vm276_vm2, %v624_v7  ;;  %v626_v9 = vld [vmem:[%s207_s24 + $0x18] sm:$0xff]  }
  0x13   : > { %585 = vmatmul.mubr.msk.bf16.vlgmr.msra.gmra.mrb[0].mxu0 %vm276_vm2, %v625_v8  ;;  %589 = vmatmul.mubr.msk.bf16.vlgmr.msra.gmra.mrb[0].mxu1 %vm276_vm2, %v626_v9 }
  0xe6   : > { %v586_v11 = vpop.f32.mrb[0].mxu0  ;;  %v590_v13 = vpop.f32.mrb[0].mxu1 }
  0xe7   : > { %v339_v12 = vadd.f32 %v586_v11, %v522_v10  ;;  %v330_v14 = vpop.f32.mrb[1].mxu0  ;;  %v355_v15 = vadd.f32 %v590_v13, %v522_v10  ;;  %v346_v17 = vpop.f32.mrb[1].mxu1 }
  0xe8   : > { %v331_v16 = vadd.f32 %v522_v10, %v330_v14  ;;  %v587_v18 = vpop.f32.mrb[2].mxu0  ;;  %v347_v19 = vadd.f32 %v522_v10, %v346_v17  ;;  %v591_v21 = vpop.f32.mrb[2].mxu1 }
  0xe9   : > { %v342_v20 = vadd.f32 %v587_v18, %v522_v10  ;;  %v333_v22 = vpop.f32.mrb[3].mxu0  ;;  %v358_v23 = vadd.f32 %v591_v21, %v522_v10  ;;  %v349_v25 = vpop.f32.mrb[3].mxu1  ;;  %v363_v26 = vmax.f32 %v339_v12, 0.0  ;;  %v367_v29 = vmax.f32 %v355_v15, 0.0 }
  0xea   : > { %v334_v24 = vadd.f32 %v522_v10, %v333_v22  ;;  %v350_v28 = vadd.f32 %v522_v10, %v349_v25  ;;  %v361_v30 = vmax.f32 %v331_v16, 0.0  ;;  %v365_v33 = vmax.f32 %v347_v19, 0.0 }
  0xeb   : > { %v364_v27 = vmax.f32 %v342_v20, 0.0  ;;  %v368_v31 = vmax.f32 %v358_v23, 0.0 }
  0xec   : > { %v362_v32 = vmax.f32 %v334_v24, 0.0  ;;  %v366_v35 = vmax.f32 %v350_v28, 0.0 }
  0xed   : > { %v559_v34 = vpack.c.bf16 %v364_v27, %v363_v26  ;;  %v569_v36 = vpack.c.bf16 %v368_v31, %v367_v29 }
  0xee   : > { %v554_v37 = vpack.c.bf16 %v362_v32, %v361_v30  ;;  %v564_v38 = vpack.c.bf16 %v366_v35, %v365_v33 }
  0xef   : > { %571 = vst [vmem:[%s223_s29 + $0x8] sm:$0xff] %v559_v34   ;;  %573 = vst [vmem:[%s223_s29 + $0x18] sm:$0xff] %v569_v36  }
  0xf0   : > { %555 = vst [vmem:[%s223_s29] sm:$0xff] %v554_v37   ;;  %572 = vst [vmem:[%s223_s29 + $0x10] sm:$0xff] %v564_v38  }
  0xf1 PF: > { %s13_s14 = sadd.s32 1, %s649_s14   ;;  %s725_s12 = smov %s645_s13 }
  0xf2   : > { %p10_p5 = scmp.ge.s32.totalorder %s13_s14, 4   ;;  %s726_s13 = smov %s728_s15 }
  0xf4   :  { %12 = sbr.rel (!%p10_p5) target bundleno = 2 (0x2), region = 68 }

// kernel: timm_backbone_forward.5
= control target key start
LH: loop header
LB: loop body
LE: loop exit
PB: predicated region body
PF: predicated region fallthrough
CT: control target
= control target key end

     0   :  { %v269_v0 = vmov 0   ;;  %vm116_vm0 = vcmask 130048   ;;  %s338_s1 = inlined_call_operand.vmem [shape: bf16[144,128], index: 1, kind: input, shape index: {}]   ;;  %s339_s0 = inlined_call_operand.vmem [shape: bf16[32,144], index: 0, kind: input, shape index: {}]   ;;  %s340_s2 = inlined_call_operand.vmem [shape: f32[1,128], index: 2, kind: input, shape index: {}]   ;;  %s341_s3 = inlined_call_operand.vmem [shape: bf16[32,128], index: 3, kind: output, shape index: {}]  }
   0x1   :  { %123 = vmatprep.subr.bf16.mxu0 %v269_v0  ;;  %235 = vmatprep.subr.bf16.mxu1 %v269_v0  ;;  %v254_v1 = vld [vmem:[%s338_s1] sm:$0xff]   ;;  %v255_v2 = vld [vmem:[%s338_s1 + $0x8] sm:$0xff]   ;;  %v256_v3 = vld [vmem:[%s338_s1 + $0x10] sm:$0xff]  }
   0x2   :  { %124 = vmatpush1.bf16.msra.mxu0 %v254_v1  ;;  %244 = vmatpush1.bf16.msra.mxu1 %v254_v1  ;;  %v257_v4 = vld [vmem:[%s338_s1 + $0x18] sm:$0xff]   ;;  %v265_v5 = vld [vmem:[%s339_s0 + $0x4] ss:$8 sps:$4 sm:$0xff]   ;;  %v260_v9 = vld [vmem:[%s338_s1 + $0x30] sm:$0xff]  }
   0x3   :  { %125 = vmatprep.subr.bf16.mxu0 %v269_v0  ;;  %236 = vmatprep.subr.bf16.mxu1 %v269_v0  ;;  %v268_v6 = vld [vmem:[%s339_s0 + $0x14] ss:$8 sps:$4 sm:$0xff]   ;;  %v258_v7 = vld [vmem:[%s338_s1 + $0x20] sm:$0xff]   ;;  %v259_v8 = vld [vmem:[%s338_s1 + $0x28] sm:$0xff]  }
   0x4   :  { %214 = vmatprep.mubr.msk.bf16.mxu0 %vm116_vm0, %v265_v5  ;;  %215 = vmatprep.mubr.msk.bf16.mxu1 %vm116_vm0, %v268_v6  ;;  %v261_v10 = vld [vmem:[%s338_s1 + $0x38] sm:$0xff]   ;;  %v262_v11 = vld [vmem:[%s338_s1 + $0x40] sm:$0xff]  }
   0x5   :  { %v263_v12 = vld [vmem:[%s339_s0] ss:$8 sps:$4 sm:$0xff]   ;;  %v266_v13 = vld [vmem:[%s339_s0 + $0x10] ss:$8 sps:$4 sm:$0xff]  }
   0x6   :  { %126 = vmatpush1.bf16.msra.mxu0 %v255_v2  ;;  %245 = vmatpush1.bf16.msra.mxu1 %v255_v2  ;;  %v200_v14 = vld [vmem:[%s340_s2] ss:$0 sm:$0xff] }
   0x7   :  { %127 = vmatprep.subr.bf16.mxu0 %v269_v0  ;;  %237 = vmatprep.subr.bf16.mxu1 %v269_v0 }
   0xa   :  { %128 = vmatpush1.bf16.msra.mxu0 %v256_v3  ;;  %246 = vmatpush1.bf16.msra.mxu1 %v256_v3 }
   0xb   :  { %129 = vmatprep.subr.bf16.mxu0 %v269_v0  ;;  %238 = vmatprep.subr.bf16.mxu1 %v269_v0 }
   0xe   :  { %130 = vmatpush1.bf16.msra.mxu0 %v257_v4  ;;  %247 = vmatpush1.bf16.msra.mxu1 %v257_v4 }
   0xf   :  { %131 = vmatprep.subr.bf16.mxu0 %v269_v0  ;;  %239 = vmatprep.subr.bf16.mxu1 %v269_v0 }
  0x12   :  { %132 = vmatpush1.bf16.msra.mxu0 %v258_v7  ;;  %248 = vmatpush1.bf16.msra.mxu1 %v258_v7 }
  0x13   :  { %133 = vmatprep.subr.bf16.mxu0 %v269_v0  ;;  %240 = vmatprep.subr.bf16.mxu1 %v269_v0 }
  0x16   :  { %134 = vmatpush1.bf16.msra.mxu0 %v259_v8  ;;  %249 = vmatpush1.bf16.msra.mxu1 %v259_v8 }
  0x17   :  { %135 = vmatprep.subr.bf16.mxu0 %v269_v0  ;;  %241 = vmatprep.subr.bf16.mxu1 %v269_v0 }
  0x1a   :  { %136 = vmatpush1.bf16.msra.mxu0 %v260_v9  ;;  %250 = vmatpush1.bf16.msra.mxu1 %v260_v9 }
  0x1b   :  { %137 = vmatprep.subr.bf16.mxu0 %v269_v0  ;;  %242 = vmatprep.subr.bf16.mxu1 %v269_v0 }
  0x1e   :  { %138 = vmatpush1.bf16.msra.mxu0 %v261_v10  ;;  %251 = vmatpush1.bf16.msra.mxu1 %v261_v10 }
  0x1f   :  { %139 = vmatprep.subr.bf16.mxu0 %v269_v0  ;;  %243 = vmatprep.subr.bf16.mxu1 %v269_v0 }
  0x22   :  { %140 = vmatpush1.bf16.msra.mxu0 %v262_v11  ;;  %252 = vmatpush1.bf16.msra.mxu1 %v262_v11 }
  0x25   :  { %156 = vmatmul.mubr.bf16.vlgmr.msra.gmra.mrb[0].mxu0 %v263_v12  ;;  %164 = vmatmul.mubr.bf16.vlgmr.msra.gmra.mrb[0].mxu1 %v266_v13 }
  0xf8   :  { %v157_v15 = vpop.f32.mrb[0].mxu0  ;;  %v165_v16 = vpop.f32.mrb[0].mxu1 }
  0xf9   :  { %v158_v17 = vadd.f32 %v200_v14, %v157_v15  ;;  %v166_v18 = vadd.f32 %v200_v14, %v165_v16  ;;  %v159_v19 = vpop.f32.mrb[1].mxu0  ;;  %v167_v20 = vpop.f32.mrb[1].mxu1 }
  0xfa   :  { %v160_v21 = vpop.f32.mrb[2].mxu0  ;;  %v168_v22 = vpop.f32.mrb[2].mxu1 }
  0xfb   :  { %v161_v23 = vadd.f32 %v200_v14, %v160_v21  ;;  %v169_v24 = vadd.f32 %v200_v14, %v168_v22  ;;  %v162_v25 = vpop.f32.mrb[3].mxu0  ;;  %v170_v26 = vpop.f32.mrb[3].mxu1  ;;  %v172_v27 = vmax.f32 %v158_v17, 0.0  ;;  %v174_v28 = vmax.f32 %v166_v18, 0.0 }
  0xfd   :  { %v173_v29 = vmax.f32 %v161_v23, 0.0  ;;  %v175_v30 = vmax.f32 %v169_v24, 0.0 }
  0xff   :  { %v227_v31 = vpack.c.bf16 %v173_v29, %v172_v27  ;;  %v232_v32 = vpack.c.bf16 %v175_v30, %v174_v28 }
 0x101   :  { %228 = vst [vmem:[%s341_s3] sm:$0xff] %v227_v31   ;;  %234 = vst [vmem:[%s341_s3 + $0x8] sm:$0xff] %v232_v32  }

// kernel: reverse
= control target key start
LH: loop header
LB: loop body
LE: loop exit
PB: predicated region body
PF: predicated region fallthrough
CT: control target
= control target key end

     0   :  { %s5265_s0 = inlined_call_operand.vmem [shape: bf16[3,3,64,576], index: 0, kind: input, shape index: {}]   ;;  %s5266_s1 = inlined_call_operand.vmem [shape: bf16[3,3,64,576], index: 1, kind: output, shape index: {}]  }
   0x1   :  { %v3815_v0 = vld [vmem:[%s5265_s0 + $0x500] sm:$0xff]   ;;  %v3824_v9 = vld [vmem:[%s5265_s0 + $0x514] sm:$0xff]   ;;  %v3833_v18 = vld [vmem:[%s5265_s0 + $0x528] sm:$0xff]  }
   0x2   :  { %v3816_v1 = vld [vmem:[%s5265_s0 + $0x320] sm:$0xff]   ;;  %3026 = vst [vmem:[%s5266_s1] sm:$0xff] %v3815_v0  ;;  %v3825_v10 = vld [vmem:[%s5265_s0 + $0x334] sm:$0xff]   ;;  %3062 = vst [vmem:[%s5266_s1 + $0x14] sm:$0xff] %v3824_v9 }
   0x3   :  { %v3817_v2 = vld [vmem:[%s5265_s0 + $0x140] sm:$0xff]   ;;  %3030 = vst [vmem:[%s5266_s1 + $0x1e0] sm:$0xff] %v3816_v1  ;;  %v3826_v11 = vld [vmem:[%s5265_s0 + $0x154] sm:$0xff]   ;;  %3066 = vst [vmem:[%s5266_s1 + $0x1f4] sm:$0xff] %v3825_v10 }
   0x4   :  { %v3818_v3 = vld [vmem:[%s5265_s0 + $0x460] sm:$0xff]   ;;  %3034 = vst [vmem:[%s5266_s1 + $0x3c0] sm:$0xff] %v3817_v2  ;;  %v3827_v12 = vld [vmem:[%s5265_s0 + $0x474] sm:$0xff]   ;;  %3070 = vst [vmem:[%s5266_s1 + $0x3d4] sm:$0xff] %v3826_v11 }
   0x5   :  { %v3819_v4 = vld [vmem:[%s5265_s0 + $0x280] sm:$0xff]   ;;  %3038 = vst [vmem:[%s5266_s1 + $0xa0] sm:$0xff] %v3818_v3  ;;  %v3828_v13 = vld [vmem:[%s5265_s0 + $0x294] sm:$0xff]   ;;  %3074 = vst [vmem:[%s5266_s1 + $0xb4] sm:$0xff] %v3827_v12 }
   0x6   :  { %v3820_v5 = vld [vmem:[%s5265_s0 + $0xa0] sm:$0xff]   ;;  %3042 = vst [vmem:[%s5266_s1 + $0x280] sm:$0xff] %v3819_v4  ;;  %v3829_v14 = vld [vmem:[%s5265_s0 + $0xb4] sm:$0xff]   ;;  %3078 = vst [vmem:[%s5266_s1 + $0x294] sm:$0xff] %v3828_v13 }
   0x7   :  { %v3821_v6 = vld [vmem:[%s5265_s0 + $0x3c0] sm:$0xff]   ;;  %3046 = vst [vmem:[%s5266_s1 + $0x460] sm:$0xff] %v3820_v5  ;;  %v3830_v15 = vld [vmem:[%s5265_s0 + $0x3d4] sm:$0xff]   ;;  %3082 = vst [vmem:[%s5266_s1 + $0x474] sm:$0xff] %v3829_v14 }
   0x8   :  { %v3822_v7 = vld [vmem:[%s5265_s0 + $0x1e0] sm:$0xff]   ;;  %3050 = vst [vmem:[%s5266_s1 + $0x140] sm:$0xff] %v3821_v6  ;;  %v3831_v16 = vld [vmem:[%s5265_s0 + $0x1f4] sm:$0xff]   ;;  %3086 = vst [vmem:[%s5266_s1 + $0x154] sm:$0xff] %v3830_v15 }
   0x9   :  { %v3823_v8 = vld [vmem:[%s5265_s0] sm:$0xff]   ;;  %3054 = vst [vmem:[%s5266_s1 + $0x320] sm:$0xff] %v3822_v7  ;;  %v3832_v17 = vld [vmem:[%s5265_s0 + $0x14] sm:$0xff]   ;;  %3090 = vst [vmem:[%s5266_s1 + $0x334] sm:$0xff] %v3831_v16 }
   0xa   :  { %3058 = vst [vmem:[%s5266_s1 + $0x500] sm:$0xff] %v3823_v8  ;;  %3094 = vst [vmem:[%s5266_s1 + $0x514] sm:$0xff] %v3832_v17  ;;  %v3834_v19 = vld [vmem:[%s5265_s0 + $0x348] sm:$0xff]   ;;  %v3842_v27 = vld [vmem:[%s5265_s0 + $0x53c] sm:$0xff]  }
   0xb   :  { %v3835_v20 = vld [vmem:[%s5265_s0 + $0x168] sm:$0xff]   ;;  %3098 = vst [vmem:[%s5266_s1 + $0x28] sm:$0xff] %v3833_v18  ;;  %3102 = vst [vmem:[%s5266_s1 + $0x208] sm:$0xff] %v3834_v19  ;;  %v3843_v28 = vld [vmem:[%s5265_s0 + $0x35c] sm:$0xff]  }
   0xc   :  { %v3836_v21 = vld [vmem:[%s5265_s0 + $0x488] sm:$0xff]   ;;  %3106 = vst [vmem:[%s5266_s1 + $0x3e8] sm:$0xff] %v3835_v20  ;;  %v3844_v29 = vld [vmem:[%s5265_s0 + $0x17c] sm:$0xff]   ;;  %3134 = vst [vmem:[%s5266_s1 + $0x3c] sm:$0xff] %v3842_v27 }
   0xd   :  { %v3837_v22 = vld [vmem:[%s5265_s0 + $0x2a8] sm:$0xff]   ;;  %3110 = vst [vmem:[%s5266_s1 + $0xc8] sm:$0xff] %v3836_v21  ;;  %v3845_v30 = vld [vmem:[%s5265_s0 + $0x49c] sm:$0xff]   ;;  %3138 = vst [vmem:[%s5266_s1 + $0x21c] sm:$0xff] %v3843_v28 }
   0xe   :  { %v3838_v23 = vld [vmem:[%s5265_s0 + $0xc8] sm:$0xff]   ;;  %3114 = vst [vmem:[%s5266_s1 + $0x2a8] sm:$0xff] %v3837_v22  ;;  %3142 = vst [vmem:[%s5266_s1 + $0x3fc] sm:$0xff] %v3844_v29  ;;  %v3846_v31 = vld [vmem:[%s5265_s0 + $0x2bc] sm:$0xff]  }
   0xf   :  { %v3839_v24 = vld [vmem:[%s5265_s0 + $0x3e8] sm:$0xff]   ;;  %3118 = vst [vmem:[%s5266_s1 + $0x488] sm:$0xff] %v3838_v23  ;;  %v3847_v32 = vld [vmem:[%s5265_s0 + $0xdc] sm:$0xff]   ;;  %3146 = vst [vmem:[%s5266_s1 + $0xdc] sm:$0xff] %v3845_v30 }
  0x10   :  { %v3840_v25 = vld [vmem:[%s5265_s0 + $0x208] sm:$0xff]   ;;  %3122 = vst [vmem:[%s5266_s1 + $0x168] sm:$0xff] %v3839_v24  ;;  %v3848_v33 = vld [vmem:[%s5265_s0 + $0x3fc] sm:$0xff]   ;;  %3150 = vst [vmem:[%s5266_s1 + $0x2bc] sm:$0xff] %v3846_v31 }
  0x11   :  { %v3841_v26 = vld [vmem:[%s5265_s0 + $0x28] sm:$0xff]   ;;  %3126 = vst [vmem:[%s5266_s1 + $0x348] sm:$0xff] %v3840_v25  ;;  %3154 = vst [vmem:[%s5266_s1 + $0x49c] sm:$0xff] %v3847_v32  ;;  %v3849_v34 = vld [vmem:[%s5265_s0 + $0x21c] sm:$0xff]  }
  0x12   :  { %3130 = vst [vmem:[%s5266_s1 + $0x528] sm:$0xff] %v3841_v26  ;;  %v3850_v35 = vld [vmem:[%s5265_s0 + $0x3c] sm:$0xff]   ;;  %3158 = vst [vmem:[%s5266_s1 + $0x17c] sm:$0xff] %v3848_v33  ;;  %v3851_v36 = vld [vmem:[%s5265_s0 + $0x550] sm:$0xff]  }
  0x13   :  { %3162 = vst [vmem:[%s5266_s1 + $0x35c] sm:$0xff] %v3849_v34  ;;  %3166 = vst [vmem:[%s5266_s1 + $0x53c] sm:$0xff] %v3850_v35  ;;  %v3852_v37 = vld [vmem:[%s5265_s0 + $0x370] sm:$0xff]   ;;  %v3860_v45 = vld [vmem:[%s5265_s0 + $0x564] sm:$0xff]  }
  0x14   :  { %v3853_v38 = vld [vmem:[%s5265_s0 + $0x190] sm:$0xff]   ;;  %3170 = vst [vmem:[%s5266_s1 + $0x50] sm:$0xff] %v3851_v36  ;;  %3174 = vst [vmem:[%s5266_s1 + $0x230] sm:$0xff] %v3852_v37  ;;  %v3861_v46 = vld [vmem:[%s5265_s0 + $0x384] sm:$0xff]  }
  0x15   :  { %v3854_v39 = vld [vmem:[%s5265_s0 + $0x4b0] sm:$0xff]   ;;  %3178 = vst [vmem:[%s5266_s1 + $0x410] sm:$0xff] %v3853_v38  ;;  %v3862_v47 = vld [vmem:[%s5265_s0 + $0x1a4] sm:$0xff]   ;;  %3206 = vst [vmem:[%s5266_s1 + $0x64] sm:$0xff] %v3860_v45 }
  0x16   :  { %v3855_v40 = vld [vmem:[%s5265_s0 + $0x2d0] sm:$0xff]   ;;  %3182 = vst [vmem:[%s5266_s1 + $0xf0] sm:$0xff] %v3854_v39  ;;  %v3863_v48 = vld [vmem:[%s5265_s0 + $0x4c4] sm:$0xff]   ;;  %3210 = vst [vmem:[%s5266_s1 + $0x244] sm:$0xff] %v3861_v46 }
  0x17   :  { %v3856_v41 = vld [vmem:[%s5265_s0 + $0xf0] sm:$0xff]   ;;  %3186 = vst [vmem:[%s5266_s1 + $0x2d0] sm:$0xff] %v3855_v40  ;;  %3214 = vst [vmem:[%s5266_s1 + $0x424] sm:$0xff] %v3862_v47  ;;  %v3864_v49 = vld [vmem:[%s5265_s0 + $0x2e4] sm:$0xff]  }
  0x18   :  { %v3857_v42 = vld [vmem:[%s5265_s0 + $0x410] sm:$0xff]   ;;  %3190 = vst [vmem:[%s5266_s1 + $0x4b0] sm:$0xff] %v3856_v41  ;;  %v3865_v50 = vld [vmem:[%s5265_s0 + $0x104] sm:$0xff]   ;;  %3218 = vst [vmem:[%s5266_s1 + $0x104] sm:$0xff] %v3863_v48 }
  0x19   :  { %v3858_v43 = vld [vmem:[%s5265_s0 + $0x230] sm:$0xff]   ;;  %3194 = vst [vmem:[%s5266_s1 + $0x190] sm:$0xff] %v3857_v42  ;;  %v3866_v51 = vld [vmem:[%s5265_s0 + $0x424] sm:$0xff]   ;;  %3222 = vst [vmem:[%s5266_s1 + $0x2e4] sm:$0xff] %v3864_v49 }
  0x1a   :  { %v3859_v44 = vld [vmem:[%s5265_s0 + $0x50] sm:$0xff]   ;;  %3198 = vst [vmem:[%s5266_s1 + $0x370] sm:$0xff] %v3858_v43  ;;  %3226 = vst [vmem:[%s5266_s1 + $0x4c4] sm:$0xff] %v3865_v50  ;;  %v3867_v52 = vld [vmem:[%s5265_s0 + $0x244] sm:$0xff]  }
  0x1b   :  { %3202 = vst [vmem:[%s5266_s1 + $0x550] sm:$0xff] %v3859_v44  ;;  %v3868_v53 = vld [vmem:[%s5265_s0 + $0x64] sm:$0xff]   ;;  %3230 = vst [vmem:[%s5266_s1 + $0x1a4] sm:$0xff] %v3866_v51  ;;  %v3869_v54 = vld [vmem:[%s5265_s0 + $0x578] sm:$0xff]  }
  0x1c   :  { %3234 = vst [vmem:[%s5266_s1 + $0x384] sm:$0xff] %v3867_v52  ;;  %3238 = vst [vmem:[%s5266_s1 + $0x564] sm:$0xff] %v3868_v53  ;;  %v3870_v55 = vld [vmem:[%s5265_s0 + $0x398] sm:$0xff]   ;;  %v3878_v63 = vld [vmem:[%s5265_s0 + $0x58c] sm:$0xff]  }
  0x1d   :  { %v3871_v56 = vld [vmem:[%s5265_s0 + $0x1b8] sm:$0xff]   ;;  %3242 = vst [vmem:[%s5266_s1 + $0x78] sm:$0xff] %v3869_v54  ;;  %3246 = vst [vmem:[%s5266_s1 + $0x258] sm:$0xff] %v3870_v55  ;;  %v3879_v0 = vld [vmem:[%s5265_s0 + $0x3ac] sm:$0xff]  }
  0x1e   :  { %v3872_v57 = vld [vmem:[%s5265_s0 + $0x4d8] sm:$0xff]   ;;  %3250 = vst [vmem:[%s5266_s1 + $0x438] sm:$0xff] %v3871_v56  ;;  %v3880_v1 = vld [vmem:[%s5265_s0 + $0x1cc] sm:$0xff]   ;;  %3278 = vst [vmem:[%s5266_s1 + $0x8c] sm:$0xff] %v3878_v63 }
  0x1f   :  { %v3873_v58 = vld [vmem:[%s5265_s0 + $0x2f8] sm:$0xff]   ;;  %3254 = vst [vmem:[%s5266_s1 + $0x118] sm:$0xff] %v3872_v57  ;;  %v3881_v2 = vld [vmem:[%s5265_s0 + $0x4ec] sm:$0xff]   ;;  %3282 = vst [vmem:[%s5266_s1 + $0x26c] sm:$0xff] %v3879_v0 }
  0x20   :  { %v3874_v59 = vld [vmem:[%s5265_s0 + $0x118] sm:$0xff]   ;;  %3258 = vst [vmem:[%s5266_s1 + $0x2f8] sm:$0xff] %v3873_v58  ;;  %3286 = vst [vmem:[%s5266_s1 + $0x44c] sm:$0xff] %v3880_v1  ;;  %v3882_v3 = vld [vmem:[%s5265_s0 + $0x30c] sm:$0xff]  }
  0x21   :  { %v3875_v60 = vld [vmem:[%s5265_s0 + $0x438] sm:$0xff]   ;;  %3262 = vst [vmem:[%s5266_s1 + $0x4d8] sm:$0xff] %v3874_v59  ;;  %v3883_v4 = vld [vmem:[%s5265_s0 + $0x12c] sm:$0xff]   ;;  %3290 = vst [vmem:[%s5266_s1 + $0x12c] sm:$0xff] %v3881_v2 }
  0x22   :  { %v3876_v61 = vld [vmem:[%s5265_s0 + $0x258] sm:$0xff]   ;;  %3266 = vst [vmem:[%s5266_s1 + $0x1b8] sm:$0xff] %v3875_v60  ;;  %v3884_v5 = vld [vmem:[%s5265_s0 + $0x44c] sm:$0xff]   ;;  %3294 = vst [vmem:[%s5266_s1 + $0x30c] sm:$0xff] %v3882_v3 }
  0x23   :  { %v3877_v62 = vld [vmem:[%s5265_s0 + $0x78] sm:$0xff]   ;;  %3270 = vst [vmem:[%s5266_s1 + $0x398] sm:$0xff] %v3876_v61  ;;  %3298 = vst [vmem:[%s5266_s1 + $0x4ec] sm:$0xff] %v3883_v4  ;;  %v3885_v6 = vld [vmem:[%s5265_s0 + $0x26c] sm:$0xff]  }
  0x24   :  { %3274 = vst [vmem:[%s5266_s1 + $0x578] sm:$0xff] %v3877_v62  ;;  %v3886_v7 = vld [vmem:[%s5265_s0 + $0x8c] sm:$0xff]   ;;  %3302 = vst [vmem:[%s5266_s1 + $0x1cc] sm:$0xff] %v3884_v5  ;;  %v3896_v17 = vld [vmem:[%s5265_s0 + $0x51c] sm:$0xff]  }
  0x25   :  { %3306 = vst [vmem:[%s5266_s1 + $0x3ac] sm:$0xff] %v3885_v6  ;;  %3310 = vst [vmem:[%s5266_s1 + $0x58c] sm:$0xff] %v3886_v7  ;;  %v3887_v8 = vld [vmem:[%s5265_s0 + $0x508] sm:$0xff]   ;;  %v3897_v18 = vld [vmem:[%s5265_s0 + $0x33c] sm:$0xff]  }
  0x26   :  { %v3888_v9 = vld [vmem:[%s5265_s0 + $0x328] sm:$0xff]   ;;  %3386 = vst [vmem:[%s5266_s1 + $0x8] sm:$0xff] %v3887_v8  ;;  %v3898_v19 = vld [vmem:[%s5265_s0 + $0x15c] sm:$0xff]   ;;  %3422 = vst [vmem:[%s5266_s1 + $0x1c] sm:$0xff] %v3896_v17 }
  0x27   :  { %v3889_v10 = vld [vmem:[%s5265_s0 + $0x148] sm:$0xff]   ;;  %3390 = vst [vmem:[%s5266_s1 + $0x1e8] sm:$0xff] %v3888_v9  ;;  %v3899_v20 = vld [vmem:[%s5265_s0 + $0x47c] sm:$0xff]   ;;  %3426 = vst [vmem:[%s5266_s1 + $0x1fc] sm:$0xff] %v3897_v18 }
  0x28   :  { %v3890_v11 = vld [vmem:[%s5265_s0 + $0x468] sm:$0xff]   ;;  %3394 = vst [vmem:[%s5266_s1 + $0x3c8] sm:$0xff] %v3889_v10  ;;  %3430 = vst [vmem:[%s5266_s1 + $0x3dc] sm:$0xff] %v3898_v19  ;;  %v3900_v21 = vld [vmem:[%s5265_s0 + $0x29c] sm:$0xff]  }
  0x29   :  { %v3891_v12 = vld [vmem:[%s5265_s0 + $0x288] sm:$0xff]   ;;  %3398 = vst [vmem:[%s5266_s1 + $0xa8] sm:$0xff] %v3890_v11  ;;  %v3901_v22 = vld [vmem:[%s5265_s0 + $0xbc] sm:$0xff]   ;;  %3434 = vst [vmem:[%s5266_s1 + $0xbc] sm:$0xff] %v3899_v20 }
  0x2a   :  { %v3892_v13 = vld [vmem:[%s5265_s0 + $0xa8] sm:$0xff]   ;;  %3402 = vst [vmem:[%s5266_s1 + $0x288] sm:$0xff] %v3891_v12  ;;  %v3902_v23 = vld [vmem:[%s5265_s0 + $0x3dc] sm:$0xff]   ;;  %3438 = vst [vmem:[%s5266_s1 + $0x29c] sm:$0xff] %v3900_v21 }
  0x2b   :  { %v3893_v14 = vld [vmem:[%s5265_s0 + $0x3c8] sm:$0xff]   ;;  %3406 = vst [vmem:[%s5266_s1 + $0x468] sm:$0xff] %v3892_v13  ;;  %3442 = vst [vmem:[%s5266_s1 + $0x47c] sm:$0xff] %v3901_v22  ;;  %v3903_v24 = vld [vmem:[%s5265_s0 + $0x1fc] sm:$0xff]  }
  0x2c   :  { %v3894_v15 = vld [vmem:[%s5265_s0 + $0x1e8] sm:$0xff]   ;;  %3410 = vst [vmem:[%s5266_s1 + $0x148] sm:$0xff] %v3893_v14  ;;  %v3904_v25 = vld [vmem:[%s5265_s0 + $0x1c] sm:$0xff]   ;;  %3446 = vst [vmem:[%s5266_s1 + $0x15c] sm:$0xff] %v3902_v23 }
  0x2d   :  { %v3895_v16 = vld [vmem:[%s5265_s0 + $0x8] sm:$0xff]   ;;  %3414 = vst [vmem:[%s5266_s1 + $0x328] sm:$0xff] %v3894_v15  ;;  %v3905_v26 = vld [vmem:[%s5265_s0 + $0x530] sm:$0xff]   ;;  %3450 = vst [vmem:[%s5266_s1 + $0x33c] sm:$0xff] %v3903_v24 }
  0x2e   :  { %3418 = vst [vmem:[%s5266_s1 + $0x508] sm:$0xff] %v3895_v16  ;;  %3454 = vst [vmem:[%s5266_s1 + $0x51c] sm:$0xff] %v3904_v25  ;;  %v3906_v27 = vld [vmem:[%s5265_s0 + $0x350] sm:$0xff]   ;;  %v3914_v35 = vld [vmem:[%s5265_s0 + $0x544] sm:$0xff]  }
  0x2f   :  { %v3907_v28 = vld [vmem:[%s5265_s0 + $0x170] sm:$0xff]   ;;  %3458 = vst [vmem:[%s5266_s1 + $0x30] sm:$0xff] %v3905_v26  ;;  %3462 = vst [vmem:[%s5266_s1 + $0x210] sm:$0xff] %v3906_v27  ;;  %v3915_v36 = vld [vmem:[%s5265_s0 + $0x364] sm:$0xff]  }
  0x30   :  { %v3908_v29 = vld [vmem:[%s5265_s0 + $0x490] sm:$0xff]   ;;  %3466 = vst [vmem:[%s5266_s1 + $0x3f0] sm:$0xff] %v3907_v28  ;;  %v3916_v37 = vld [vmem:[%s5265_s0 + $0x184] sm:$0xff]   ;;  %3494 = vst [vmem:[%s5266_s1 + $0x44] sm:$0xff] %v3914_v35 }
  0x31   :  { %v3909_v30 = vld [vmem:[%s5265_s0 + $0x2b0] sm:$0xff]   ;;  %3470 = vst [vmem:[%s5266_s1 + $0xd0] sm:$0xff] %v3908_v29  ;;  %v3917_v38 = vld [vmem:[%s5265_s0 + $0x4a4] sm:$0xff]   ;;  %3498 = vst [vmem:[%s5266_s1 + $0x224] sm:$0xff] %v3915_v36 }
  0x32   :  { %v3910_v31 = vld [vmem:[%s5265_s0 + $0xd0] sm:$0xff]   ;;  %3474 = vst [vmem:[%s5266_s1 + $0x2b0] sm:$0xff] %v3909_v30  ;;  %3502 = vst [vmem:[%s5266_s1 + $0x404] sm:$0xff] %v3916_v37  ;;  %v3918_v39 = vld [vmem:[%s5265_s0 + $0x2c4] sm:$0xff]  }
  0x33   :  { %v3911_v32 = vld [vmem:[%s5265_s0 + $0x3f0] sm:$0xff]   ;;  %3478 = vst [vmem:[%s5266_s1 + $0x490] sm:$0xff] %v3910_v31  ;;  %v3919_v40 = vld [vmem:[%s5265_s0 + $0xe4] sm:$0xff]   ;;  %3506 = vst [vmem:[%s5266_s1 + $0xe4] sm:$0xff] %v3917_v38 }
  0x34   :  { %v3912_v33 = vld [vmem:[%s5265_s0 + $0x210] sm:$0xff]   ;;  %3482 = vst [vmem:[%s5266_s1 + $0x170] sm:$0xff] %v3911_v32  ;;  %v3920_v41 = vld [vmem:[%s5265_s0 + $0x404] sm:$0xff]   ;;  %3510 = vst [vmem:[%s5266_s1 + $0x2c4] sm:$0xff] %v3918_v39 }
  0x35   :  { %v3913_v34 = vld [vmem:[%s5265_s0 + $0x30] sm:$0xff]   ;;  %3486 = vst [vmem:[%s5266_s1 + $0x350] sm:$0xff] %v3912_v33  ;;  %3514 = vst [vmem:[%s5266_s1 + $0x4a4] sm:$0xff] %v3919_v40  ;;  %v3921_v42 = vld [vmem:[%s5265_s0 + $0x224] sm:$0xff]  }
  0x36   :  { %3490 = vst [vmem:[%s5266_s1 + $0x530] sm:$0xff] %v3913_v34  ;;  %v3922_v43 = vld [vmem:[%s5265_s0 + $0x44] sm:$0xff]   ;;  %3518 = vst [vmem:[%s5266_s1 + $0x184] sm:$0xff] %v3920_v41  ;;  %v3923_v44 = vld [vmem:[%s5265_s0 + $0x558] sm:$0xff]  }
  0x37   :  { %3522 = vst [vmem:[%s5266_s1 + $0x364] sm:$0xff] %v3921_v42  ;;  %3526 = vst [vmem:[%s5266_s1 + $0x544] sm:$0xff] %v3922_v43  ;;  %v3924_v45 = vld [vmem:[%s5265_s0 + $0x378] sm:$0xff]   ;;  %v3932_v53 = vld [vmem:[%s5265_s0 + $0x56c] sm:$0xff]  }
  0x38   :  { %v3925_v46 = vld [vmem:[%s5265_s0 + $0x198] sm:$0xff]   ;;  %3530 = vst [vmem:[%s5266_s1 + $0x58] sm:$0xff] %v3923_v44  ;;  %3534 = vst [vmem:[%s5266_s1 + $0x238] sm:$0xff] %v3924_v45  ;;  %v3933_v54 = vld [vmem:[%s5265_s0 + $0x38c] sm:$0xff]  }
  0x39   :  { %v3926_v47 = vld [vmem:[%s5265_s0 + $0x4b8] sm:$0xff]   ;;  %3538 = vst [vmem:[%s5266_s1 + $0x418] sm:$0xff] %v3925_v46  ;;  %v3934_v55 = vld [vmem:[%s5265_s0 + $0x1ac] sm:$0xff]   ;;  %3566 = vst [vmem:[%s5266_s1 + $0x6c] sm:$0xff] %v3932_v53 }
  0x3a   :  { %v3927_v48 = vld [vmem:[%s5265_s0 + $0x2d8] sm:$0xff]   ;;  %3542 = vst [vmem:[%s5266_s1 + $0xf8] sm:$0xff] %v3926_v47  ;;  %v3935_v56 = vld [vmem:[%s5265_s0 + $0x4cc] sm:$0xff]   ;;  %3570 = vst [vmem:[%s5266_s1 + $0x24c] sm:$0xff] %v3933_v54 }
  0x3b   :  { %v3928_v49 = vld [vmem:[%s5265_s0 + $0xf8] sm:$0xff]   ;;  %3546 = vst [vmem:[%s5266_s1 + $0x2d8] sm:$0xff] %v3927_v48  ;;  %3574 = vst [vmem:[%s5266_s1 + $0x42c] sm:$0xff] %v3934_v55  ;;  %v3936_v57 = vld [vmem:[%s5265_s0 + $0x2ec] sm:$0xff]  }
  0x3c   :  { %v3929_v50 = vld [vmem:[%s5265_s0 + $0x418] sm:$0xff]   ;;  %3550 = vst [vmem:[%s5266_s1 + $0x4b8] sm:$0xff] %v3928_v49  ;;  %v3937_v58 = vld [vmem:[%s5265_s0 + $0x10c] sm:$0xff]   ;;  %3578 = vst [vmem:[%s5266_s1 + $0x10c] sm:$0xff] %v3935_v56 }
  0x3d   :  { %v3930_v51 = vld [vmem:[%s5265_s0 + $0x238] sm:$0xff]   ;;  %3554 = vst [vmem:[%s5266_s1 + $0x198] sm:$0xff] %v3929_v50  ;;  %v3938_v59 = vld [vmem:[%s5265_s0 + $0x42c] sm:$0xff]   ;;  %3582 = vst [vmem:[%s5266_s1 + $0x2ec] sm:$0xff] %v3936_v57 }
  0x3e   :  { %v3931_v52 = vld [vmem:[%s5265_s0 + $0x58] sm:$0xff]   ;;  %3558 = vst [vmem:[%s5266_s1 + $0x378] sm:$0xff] %v3930_v51  ;;  %3586 = vst [vmem:[%s5266_s1 + $0x4cc] sm:$0xff] %v3937_v58  ;;  %v3939_v60 = vld [vmem:[%s5265_s0 + $0x24c] sm:$0xff]  }
  0x3f   :  { %3562 = vst [vmem:[%s5266_s1 + $0x558] sm:$0xff] %v3931_v52  ;;  %v3940_v61 = vld [vmem:[%s5265_s0 + $0x6c] sm:$0xff]   ;;  %3590 = vst [vmem:[%s5266_s1 + $0x1ac] sm:$0xff] %v3938_v59  ;;  %v3941_v62 = vld [vmem:[%s5265_s0 + $0x580] sm:$0xff]  }
  0x40   :  { %3594 = vst [vmem:[%s5266_s1 + $0x38c] sm:$0xff] %v3939_v60  ;;  %3598 = vst [vmem:[%s5266_s1 + $0x56c] sm:$0xff] %v3940_v61  ;;  %v3942_v63 = vld [vmem:[%s5265_s0 + $0x3a0] sm:$0xff]   ;;  %v3950_v7 = vld [vmem:[%s5265_s0 + $0x594] sm:$0xff]  }
  0x41   :  { %v3943_v0 = vld [vmem:[%s5265_s0 + $0x1c0] sm:$0xff]   ;;  %3602 = vst [vmem:[%s5266_s1 + $0x80] sm:$0xff] %v3941_v62  ;;  %3606 = vst [vmem:[%s5266_s1 + $0x260] sm:$0xff] %v3942_v63  ;;  %v3951_v8 = vld [vmem:[%s5265_s0 + $0x3b4] sm:$0xff]  }
  0x42   :  { %v3944_v1 = vld [vmem:[%s5265_s0 + $0x4e0] sm:$0xff]   ;;  %3610 = vst [vmem:[%s5266_s1 + $0x440] sm:$0xff] %v3943_v0  ;;  %v3952_v9 = vld [vmem:[%s5265_s0 + $0x1d4] sm:$0xff]   ;;  %3638 = vst [vmem:[%s5266_s1 + $0x94] sm:$0xff] %v3950_v7 }
  0x43   :  { %v3945_v2 = vld [vmem:[%s5265_s0 + $0x300] sm:$0xff]   ;;  %3614 = vst [vmem:[%s5266_s1 + $0x120] sm:$0xff] %v3944_v1  ;;  %v3953_v10 = vld [vmem:[%s5265_s0 + $0x4f4] sm:$0xff]   ;;  %3642 = vst [vmem:[%s5266_s1 + $0x274] sm:$0xff] %v3951_v8 }
  0x44   :  { %v3946_v3 = vld [vmem:[%s5265_s0 + $0x120] sm:$0xff]   ;;  %3618 = vst [vmem:[%s5266_s1 + $0x300] sm:$0xff] %v3945_v2  ;;  %3646 = vst [vmem:[%s5266_s1 + $0x454] sm:$0xff] %v3952_v9  ;;  %v3954_v11 = vld [vmem:[%s5265_s0 + $0x314] sm:$0xff]  }
  0x45   :  { %v3947_v4 = vld [vmem:[%s5265_s0 + $0x440] sm:$0xff]   ;;  %3622 = vst [vmem:[%s5266_s1 + $0x4e0] sm:$0xff] %v3946_v3  ;;  %v3955_v12 = vld [vmem:[%s5265_s0 + $0x134] sm:$0xff]   ;;  %3650 = vst [vmem:[%s5266_s1 + $0x134] sm:$0xff] %v3953_v10 }
  0x46   :  { %v3948_v5 = vld [vmem:[%s5265_s0 + $0x260] sm:$0xff]   ;;  %3626 = vst [vmem:[%s5266_s1 + $0x1c0] sm:$0xff] %v3947_v4  ;;  %v3956_v13 = vld [vmem:[%s5265_s0 + $0x454] sm:$0xff]   ;;  %3654 = vst [vmem:[%s5266_s1 + $0x314] sm:$0xff] %v3954_v11 }
  0x47   :  { %v3949_v6 = vld [vmem:[%s5265_s0 + $0x80] sm:$0xff]   ;;  %3630 = vst [vmem:[%s5266_s1 + $0x3a0] sm:$0xff] %v3948_v5  ;;  %3658 = vst [vmem:[%s5266_s1 + $0x4f4] sm:$0xff] %v3955_v12  ;;  %v3957_v14 = vld [vmem:[%s5265_s0 + $0x274] sm:$0xff]  }
  0x48   :  { %3634 = vst [vmem:[%s5266_s1 + $0x580] sm:$0xff] %v3949_v6  ;;  %v3958_v15 = vld [vmem:[%s5265_s0 + $0x94] sm:$0xff]   ;;  %3662 = vst [vmem:[%s5266_s1 + $0x1d4] sm:$0xff] %v3956_v13  ;;  %v3671_v16 = vld [vmem:[%s5265_s0 + $0x510] sm:$0xf] }
  0x49   :  { %v3673_v17 = vld [vmem:[%s5265_s0 + $0x330] sm:$0xf]  ;;  %3666 = vst [vmem:[%s5266_s1 + $0x3b4] sm:$0xff] %v3957_v14  ;;  %3670 = vst [vmem:[%s5266_s1 + $0x594] sm:$0xff] %v3958_v15  ;;  %v3689_v25 = vld [vmem:[%s5265_s0 + $0x524] sm:$0xf] }
  0x4a   :  { %v3675_v18 = vld [vmem:[%s5265_s0 + $0x150] sm:$0xf]  ;;  %3672 = vst [vmem:[%s5266_s1 + $0x10] sm:$0xf] %v3671_v16  ;;  %3674 = vst [vmem:[%s5266_s1 + $0x1f0] sm:$0xf] %v3673_v17 }
  0x4b   :  { %3676 = vst [vmem:[%s5266_s1 + $0x3d0] sm:$0xf] %v3675_v18  ;;  %v3677_v19 = vld [vmem:[%s5265_s0 + $0x470] sm:$0xf]  ;;  %v3691_v26 = vld [vmem:[%s5265_s0 + $0x344] sm:$0xf] }
  0x4c   :  { %v3679_v20 = vld [vmem:[%s5265_s0 + $0x290] sm:$0xf]  ;;  %3678 = vst [vmem:[%s5266_s1 + $0xb0] sm:$0xf] %v3677_v19  ;;  %v3693_v27 = vld [vmem:[%s5265_s0 + $0x164] sm:$0xf] }
  0x4d   :  { %v3681_v21 = vld [vmem:[%s5265_s0 + $0xb0] sm:$0xf]  ;;  %3680 = vst [vmem:[%s5266_s1 + $0x290] sm:$0xf] %v3679_v20  ;;  %3690 = vst [vmem:[%s5266_s1 + $0x24] sm:$0xf] %v3689_v25 }
  0x4e   :  { %3682 = vst [vmem:[%s5266_s1 + $0x470] sm:$0xf] %v3681_v21  ;;  %v3683_v22 = vld [vmem:[%s5265_s0 + $0x3d0] sm:$0xf]  ;;  %3692 = vst [vmem:[%s5266_s1 + $0x204] sm:$0xf] %v3691_v26 }
  0x4f   :  { %v3685_v23 = vld [vmem:[%s5265_s0 + $0x1f0] sm:$0xf]  ;;  %3684 = vst [vmem:[%s5266_s1 + $0x150] sm:$0xf] %v3683_v22  ;;  %3694 = vst [vmem:[%s5266_s1 + $0x3e4] sm:$0xf] %v3693_v27 }
  0x50   :  { %v3687_v24 = vld [vmem:[%s5265_s0 + $0x10] sm:$0xf]  ;;  %3686 = vst [vmem:[%s5266_s1 + $0x330] sm:$0xf] %v3685_v23  ;;  %v3695_v28 = vld [vmem:[%s5265_s0 + $0x484] sm:$0xf] }
  0x51   :  { %3688 = vst [vmem:[%s5266_s1 + $0x510] sm:$0xf] %v3687_v24  ;;  %v3697_v29 = vld [vmem:[%s5265_s0 + $0x2a4] sm:$0xf]  ;;  %3696 = vst [vmem:[%s5266_s1 + $0xc4] sm:$0xf] %v3695_v28 }
  0x52   :  { %v3699_v30 = vld [vmem:[%s5265_s0 + $0xc4] sm:$0xf]  ;;  %3698 = vst [vmem:[%s5266_s1 + $0x2a4] sm:$0xf] %v3697_v29  ;;  %v3707_v34 = vld [vmem:[%s5265_s0 + $0x538] sm:$0xf] }
  0x53   :  { %3700 = vst [vmem:[%s5266_s1 + $0x484] sm:$0xf] %v3699_v30  ;;  %v3701_v31 = vld [vmem:[%s5265_s0 + $0x3e4] sm:$0xf]  ;;  %v3709_v35 = vld [vmem:[%s5265_s0 + $0x358] sm:$0xf] }
  0x54   :  { %v3703_v32 = vld [vmem:[%s5265_s0 + $0x204] sm:$0xf]  ;;  %3702 = vst [vmem:[%s5266_s1 + $0x164] sm:$0xf] %v3701_v31  ;;  %v3711_v36 = vld [vmem:[%s5265_s0 + $0x178] sm:$0xf] }
  0x55   :  { %v3705_v33 = vld [vmem:[%s5265_s0 + $0x24] sm:$0xf]  ;;  %3704 = vst [vmem:[%s5266_s1 + $0x344] sm:$0xf] %v3703_v32  ;;  %3708 = vst [vmem:[%s5266_s1 + $0x38] sm:$0xf] %v3707_v34 }
  0x56   :  { %3706 = vst [vmem:[%s5266_s1 + $0x524] sm:$0xf] %v3705_v33  ;;  %3710 = vst [vmem:[%s5266_s1 + $0x218] sm:$0xf] %v3709_v35  ;;  %v3713_v37 = vld [vmem:[%s5265_s0 + $0x498] sm:$0xf] }
  0x57   :  { %3712 = vst [vmem:[%s5266_s1 + $0x3f8] sm:$0xf] %v3711_v36  ;;  %v3715_v38 = vld [vmem:[%s5265_s0 + $0x2b8] sm:$0xf]  ;;  %3714 = vst [vmem:[%s5266_s1 + $0xd8] sm:$0xf] %v3713_v37 }
  0x58   :  { %v3717_v39 = vld [vmem:[%s5265_s0 + $0xd8] sm:$0xf]  ;;  %3716 = vst [vmem:[%s5266_s1 + $0x2b8] sm:$0xf] %v3715_v38  ;;  %v3725_v43 = vld [vmem:[%s5265_s0 + $0x54c] sm:$0xf] }
  0x59   :  { %3718 = vst [vmem:[%s5266_s1 + $0x498] sm:$0xf] %v3717_v39  ;;  %v3719_v40 = vld [vmem:[%s5265_s0 + $0x3f8] sm:$0xf]  ;;  %v3727_v44 = vld [vmem:[%s5265_s0 + $0x36c] sm:$0xf] }
  0x5a   :  { %v3721_v41 = vld [vmem:[%s5265_s0 + $0x218] sm:$0xf]  ;;  %3720 = vst [vmem:[%s5266_s1 + $0x178] sm:$0xf] %v3719_v40  ;;  %v3729_v45 = vld [vmem:[%s5265_s0 + $0x18c] sm:$0xf] }
  0x5b   :  { %v3723_v42 = vld [vmem:[%s5265_s0 + $0x38] sm:$0xf]  ;;  %3722 = vst [vmem:[%s5266_s1 + $0x358] sm:$0xf] %v3721_v41  ;;  %3726 = vst [vmem:[%s5266_s1 + $0x4c] sm:$0xf] %v3725_v43 }
  0x5c   :  { %3724 = vst [vmem:[%s5266_s1 + $0x538] sm:$0xf] %v3723_v42  ;;  %3728 = vst [vmem:[%s5266_s1 + $0x22c] sm:$0xf] %v3727_v44  ;;  %v3731_v46 = vld [vmem:[%s5265_s0 + $0x4ac] sm:$0xf] }
  0x5d   :  { %3730 = vst [vmem:[%s5266_s1 + $0x40c] sm:$0xf] %v3729_v45  ;;  %v3733_v47 = vld [vmem:[%s5265_s0 + $0x2cc] sm:$0xf]  ;;  %3732 = vst [vmem:[%s5266_s1 + $0xec] sm:$0xf] %v3731_v46 }
  0x5e   :  { %v3735_v48 = vld [vmem:[%s5265_s0 + $0xec] sm:$0xf]  ;;  %3734 = vst [vmem:[%s5266_s1 + $0x2cc] sm:$0xf] %v3733_v47  ;;  %v3743_v52 = vld [vmem:[%s5265_s0 + $0x560] sm:$0xf] }
  0x5f   :  { %3736 = vst [vmem:[%s5266_s1 + $0x4ac] sm:$0xf] %v3735_v48  ;;  %v3737_v49 = vld [vmem:[%s5265_s0 + $0x40c] sm:$0xf]  ;;  %v3745_v53 = vld [vmem:[%s5265_s0 + $0x380] sm:$0xf] }
  0x60   :  { %v3739_v50 = vld [vmem:[%s5265_s0 + $0x22c] sm:$0xf]  ;;  %3738 = vst [vmem:[%s5266_s1 + $0x18c] sm:$0xf] %v3737_v49  ;;  %v3747_v54 = vld [vmem:[%s5265_s0 + $0x1a0] sm:$0xf] }
  0x61   :  { %v3741_v51 = vld [vmem:[%s5265_s0 + $0x4c] sm:$0xf]  ;;  %3740 = vst [vmem:[%s5266_s1 + $0x36c] sm:$0xf] %v3739_v50  ;;  %3744 = vst [vmem:[%s5266_s1 + $0x60] sm:$0xf] %v3743_v52 }
  0x62   :  { %3742 = vst [vmem:[%s5266_s1 + $0x54c] sm:$0xf] %v3741_v51  ;;  %3746 = vst [vmem:[%s5266_s1 + $0x240] sm:$0xf] %v3745_v53  ;;  %v3749_v55 = vld [vmem:[%s5265_s0 + $0x4c0] sm:$0xf] }
  0x63   :  { %3748 = vst [vmem:[%s5266_s1 + $0x420] sm:$0xf] %v3747_v54  ;;  %v3751_v56 = vld [vmem:[%s5265_s0 + $0x2e0] sm:$0xf]  ;;  %3750 = vst [vmem:[%s5266_s1 + $0x100] sm:$0xf] %v3749_v55 }
  0x64   :  { %v3753_v57 = vld [vmem:[%s5265_s0 + $0x100] sm:$0xf]  ;;  %3752 = vst [vmem:[%s5266_s1 + $0x2e0] sm:$0xf] %v3751_v56  ;;  %v3761_v61 = vld [vmem:[%s5265_s0 + $0x574] sm:$0xf] }
  0x65   :  { %3754 = vst [vmem:[%s5266_s1 + $0x4c0] sm:$0xf] %v3753_v57  ;;  %v3755_v58 = vld [vmem:[%s5265_s0 + $0x420] sm:$0xf]  ;;  %v3763_v62 = vld [vmem:[%s5265_s0 + $0x394] sm:$0xf] }
  0x66   :  { %v3757_v59 = vld [vmem:[%s5265_s0 + $0x240] sm:$0xf]  ;;  %3756 = vst [vmem:[%s5266_s1 + $0x1a0] sm:$0xf] %v3755_v58  ;;  %v3765_v63 = vld [vmem:[%s5265_s0 + $0x1b4] sm:$0xf] }
  0x67   :  { %v3759_v60 = vld [vmem:[%s5265_s0 + $0x60] sm:$0xf]  ;;  %3758 = vst [vmem:[%s5266_s1 + $0x380] sm:$0xf] %v3757_v59  ;;  %3762 = vst [vmem:[%s5266_s1 + $0x74] sm:$0xf] %v3761_v61 }
  0x68   :  { %3760 = vst [vmem:[%s5266_s1 + $0x560] sm:$0xf] %v3759_v60  ;;  %3764 = vst [vmem:[%s5266_s1 + $0x254] sm:$0xf] %v3763_v62  ;;  %v3767_v0 = vld [vmem:[%s5265_s0 + $0x4d4] sm:$0xf] }
  0x69   :  { %3766 = vst [vmem:[%s5266_s1 + $0x434] sm:$0xf] %v3765_v63  ;;  %v3769_v1 = vld [vmem:[%s5265_s0 + $0x2f4] sm:$0xf]  ;;  %3768 = vst [vmem:[%s5266_s1 + $0x114] sm:$0xf] %v3767_v0 }
  0x6a   :  { %v3771_v2 = vld [vmem:[%s5265_s0 + $0x114] sm:$0xf]  ;;  %3770 = vst [vmem:[%s5266_s1 + $0x2f4] sm:$0xf] %v3769_v1  ;;  %v3779_v6 = vld [vmem:[%s5265_s0 + $0x588] sm:$0xf] }
  0x6b   :  { %3772 = vst [vmem:[%s5266_s1 + $0x4d4] sm:$0xf] %v3771_v2  ;;  %v3773_v3 = vld [vmem:[%s5265_s0 + $0x434] sm:$0xf]  ;;  %v3781_v7 = vld [vmem:[%s5265_s0 + $0x3a8] sm:$0xf] }
  0x6c   :  { %v3775_v4 = vld [vmem:[%s5265_s0 + $0x254] sm:$0xf]  ;;  %3774 = vst [vmem:[%s5266_s1 + $0x1b4] sm:$0xf] %v3773_v3  ;;  %v3783_v8 = vld [vmem:[%s5265_s0 + $0x1c8] sm:$0xf] }
  0x6d   :  { %v3777_v5 = vld [vmem:[%s5265_s0 + $0x74] sm:$0xf]  ;;  %3776 = vst [vmem:[%s5266_s1 + $0x394] sm:$0xf] %v3775_v4  ;;  %3780 = vst [vmem:[%s5266_s1 + $0x88] sm:$0xf] %v3779_v6 }
  0x6e   :  { %3778 = vst [vmem:[%s5266_s1 + $0x574] sm:$0xf] %v3777_v5  ;;  %3782 = vst [vmem:[%s5266_s1 + $0x268] sm:$0xf] %v3781_v7  ;;  %v3785_v9 = vld [vmem:[%s5265_s0 + $0x4e8] sm:$0xf] }
  0x6f   :  { %3784 = vst [vmem:[%s5266_s1 + $0x448] sm:$0xf] %v3783_v8  ;;  %v3787_v10 = vld [vmem:[%s5265_s0 + $0x308] sm:$0xf]  ;;  %3786 = vst [vmem:[%s5266_s1 + $0x128] sm:$0xf] %v3785_v9 }
  0x70   :  { %v3789_v11 = vld [vmem:[%s5265_s0 + $0x128] sm:$0xf]  ;;  %3788 = vst [vmem:[%s5266_s1 + $0x308] sm:$0xf] %v3787_v10  ;;  %v3797_v15 = vld [vmem:[%s5265_s0 + $0x59c] sm:$0xf] }
  0x71   :  { %3790 = vst [vmem:[%s5266_s1 + $0x4e8] sm:$0xf] %v3789_v11  ;;  %v3791_v12 = vld [vmem:[%s5265_s0 + $0x448] sm:$0xf]  ;;  %v3799_v16 = vld [vmem:[%s5265_s0 + $0x3bc] sm:$0xf] }
  0x72   :  { %v3793_v13 = vld [vmem:[%s5265_s0 + $0x268] sm:$0xf]  ;;  %3792 = vst [vmem:[%s5266_s1 + $0x1c8] sm:$0xf] %v3791_v12  ;;  %v3801_v17 = vld [vmem:[%s5265_s0 + $0x1dc] sm:$0xf] }
  0x73   :  { %v3795_v14 = vld [vmem:[%s5265_s0 + $0x88] sm:$0xf]  ;;  %3794 = vst [vmem:[%s5266_s1 + $0x3a8] sm:$0xf] %v3793_v13  ;;  %3798 = vst [vmem:[%s5266_s1 + $0x9c] sm:$0xf] %v3797_v15 }
  0x74   :  { %3796 = vst [vmem:[%s5266_s1 + $0x588] sm:$0xf] %v3795_v14  ;;  %3800 = vst [vmem:[%s5266_s1 + $0x27c] sm:$0xf] %v3799_v16  ;;  %v3803_v18 = vld [vmem:[%s5265_s0 + $0x4fc] sm:$0xf] }
  0x75   :  { %3802 = vst [vmem:[%s5266_s1 + $0x45c] sm:$0xf] %v3801_v17  ;;  %v3805_v19 = vld [vmem:[%s5265_s0 + $0x31c] sm:$0xf]  ;;  %3804 = vst [vmem:[%s5266_s1 + $0x13c] sm:$0xf] %v3803_v18 }
  0x76   :  { %v3807_v20 = vld [vmem:[%s5265_s0 + $0x13c] sm:$0xf]  ;;  %3806 = vst [vmem:[%s5266_s1 + $0x31c] sm:$0xf] %v3805_v19 }
  0x77   :  { %3808 = vst [vmem:[%s5266_s1 + $0x4fc] sm:$0xf] %v3807_v20  ;;  %v3809_v21 = vld [vmem:[%s5265_s0 + $0x45c] sm:$0xf] }
  0x78   :  { %v3811_v22 = vld [vmem:[%s5265_s0 + $0x27c] sm:$0xf]  ;;  %3810 = vst [vmem:[%s5266_s1 + $0x1dc] sm:$0xf] %v3809_v21 }
  0x79   :  { %v3813_v23 = vld [vmem:[%s5265_s0 + $0x9c] sm:$0xf]  ;;  %3812 = vst [vmem:[%s5266_s1 + $0x3bc] sm:$0xf] %v3811_v22 }
  0x7a   :  { %3814 = vst [vmem:[%s5266_s1 + $0x59c] sm:$0xf] %v3813_v23 }

// kernel: timm_backbone_forward.6
= control target key start
LH: loop header
LB: loop body
LE: loop exit
PB: predicated region body
PF: predicated region fallthrough
CT: control target
= control target key end

     0   :  { %v348_v1 = vmov 0.0   ;;  %vm349_vm0 = vmmov 0   ;;  %vm178_vm1 = vcmask 261120   ;;  %s436_s1 = inlined_call_operand.vmem [shape: bf16[288,128], index: 1, kind: input, shape index: {}]   ;;  %s437_s0 = inlined_call_operand.vmem [shape: bf16[8,288], index: 0, kind: input, shape index: {}]   ;;  %s438_s2 = inlined_call_operand.vmem [shape: f32[1,128], index: 2, kind: input, shape index: {}]   ;;  %s439_s3 = inlined_call_operand.vmem [shape: bf16[8,128], index: 3, kind: output, shape index: {}]  }
   0x1   :  { %v327_v0 = vld [vmem:[%s436_s1 + $0x40] sm:$0xff]   ;;  %317 = vmatprep.subr.bf16.mxu1 %v348_v1  ;;  %321 = vmatprep.mubr.msk.bf16.mxu1 %vm349_vm0, %v348_v1  ;;  %v329_v3 = vld [vmem:[%s436_s1 + $0x48] sm:$0xff]   ;;  %v331_v5 = vld [vmem:[%s436_s1 + $0x50] sm:$0xff]  }
   0x2   :  { %v328_v2 = vld [vmem:[%s436_s1] sm:$0xff]   ;;  %292 = vmatprep.subr.bf16.mxu0 %v327_v0  ;;  %v330_v4 = vld [vmem:[%s436_s1 + $0x8] sm:$0xff]   ;;  %v332_v6 = vld [vmem:[%s436_s1 + $0x10] sm:$0xff]  }
   0x3   :  { %293 = vmatpush3.bf16.msra.mxu0 %v328_v2  ;;  %v333_v7 = vld [vmem:[%s436_s1 + $0x58] sm:$0xff]   ;;  %v335_v9 = vld [vmem:[%s436_s1 + $0x60] sm:$0xff]   ;;  %v337_v12 = vld [vmem:[%s436_s1 + $0x68] sm:$0xff]  }
   0x4   :  { %294 = vmatprep.subr.bf16.mxu0 %v329_v3  ;;  %v334_v8 = vld [vmem:[%s436_s1 + $0x18] sm:$0xff]   ;;  %v341_v10 = vld [vmem:[%s436_s1 + $0x80] sm:$0xff]   ;;  %v347_v15 = vld [vmem:[%s436_s1 + $0x88] sm:$0xff]  }
   0x5   :  { %v336_v11 = vld [vmem:[%s436_s1 + $0x20] sm:$0xff]   ;;  %318 = vmatpush3.bf16.msra.mxu1 %v341_v10  ;;  %v338_v16 = vld [vmem:[%s436_s1 + $0x28] sm:$0xff]   ;;  %v339_v17 = vld [vmem:[%s436_s1 + $0x70] sm:$0xff]  }
   0x6   :  { %319 = vmatprep.subr.bf16.mxu1 %v348_v1  ;;  %v15_v13 = vld [vmem:[%s437_s0] sm:$0xff]  ;;  %v346_v18 = vld [vmem:[%s437_s0 + $0x8] ss:$0 sps:$4 sm:$0xff]   ;;  %v340_v19 = vld [vmem:[%s436_s1 + $0x30] sm:$0xff]  }
   0x7   :  { %295 = vmatpush3.bf16.msra.mxu0 %v330_v4  ;;  %v271_v14 = vcombine.high %v15_v13, %v15_v13  ;;  %v342_v20 = vld [vmem:[%s436_s1 + $0x78] sm:$0xff]   ;;  %v270_v22 = vcombine.low %v15_v13, %v15_v13  ;;  %v269_v29 = vld [vmem:[%s438_s2] ss:$0 sm:$0xff] }
   0x8   :  { %296 = vmatprep.subr.bf16.mxu0 %v331_v5  ;;  %v343_v21 = vld [vmem:[%s436_s1 + $0x38] sm:$0xff]  }
   0x9   :  { %214 = vmatprep.mubr.bf16.mxu0 %v271_v14  ;;  %320 = vmatpush3.bf16.msra.mxu1 %v347_v15 }
   0xb   :  { %297 = vmatpush3.bf16.msra.mxu0 %v332_v6 }
   0xc   :  { %298 = vmatprep.subr.bf16.mxu0 %v333_v7  ;;  %322 = vmatmul.mubr.msk.bf16.vlgmr.msra.gmra.mrb[0].mxu1 %vm178_vm1, %v346_v18 }
   0xf   :  { %299 = vmatpush3.bf16.msra.mxu0 %v334_v8 }
  0x10   :  { %300 = vmatprep.subr.bf16.mxu0 %v335_v9 }
  0x13   :  { %301 = vmatpush3.bf16.msra.mxu0 %v336_v11 }
  0x14   :  { %302 = vmatprep.subr.bf16.mxu0 %v337_v12 }
  0x17   :  { %303 = vmatpush3.bf16.msra.mxu0 %v338_v16 }
  0x18   :  { %304 = vmatprep.subr.bf16.mxu0 %v339_v17 }
  0x1b   :  { %305 = vmatpush3.bf16.msra.mxu0 %v340_v19 }
  0x1c   :  { %306 = vmatprep.subr.bf16.mxu0 %v342_v20 }
  0x1f   :  { %307 = vmatpush3.bf16.msra.mxu0 %v343_v21 }
  0x22   :  { %215 = vmatmul.mubr.bf16.vlgmr.msra.gmra.mrb[0].mxu0 %v270_v22 }
  0xdf   :  { %v256_v23 = vpop.f32.mrb[0].mxu1 }
  0xe0   :  { %v323_v24 = vpop.f32.mrb[1].mxu1 }
  0xe1   :  { %v259_v25 = vpop.f32.mrb[2].mxu1 }
  0xe2   :  { %v324_v26 = vpop.f32.mrb[3].mxu1 }
  0xf5   :  { %v308_v27 = vpop.f32.mrb[0].mxu0 }
  0xf6   :  { %v309_v28 = vpop.f32.mrb[1].mxu0 }
  0xf7   :  { %v310_v30 = vadd.f32 %v309_v28, %v308_v27  ;;  %v311_v31 = vpop.f32.mrb[2].mxu0 }
  0xf8   :  { %v312_v32 = vpop.f32.mrb[3].mxu0 }
  0xf9   :  { %v217_v33 = vadd.f32 %v310_v30, %v269_v29 }
  0xfb   :  { %v257_v34 = vadd.f32 %v256_v23, %v217_v33 }
  0xfd   :  { %v262_v35 = vmax.f32 %v257_v34, 0.0 }
  0xff   :  { %v263_v36 = vpack.c.bf16 %v262_v35, %v262_v35 }
 0x101   :  { %264 = vst [vmem:[%s439_s3] sm:$0xf] %v263_v36 }

// kernel: timm_backbone_forward.7
= control target key start
LH: loop header
LB: loop body
LE: loop exit
PB: predicated region body
PF: predicated region fallthrough
CT: control target
= control target key end

     0   :  { %v625_v21 = vmov 1966171168   ;;  %v100_v23 = vlaneseq  ;;  %v626_v40 = vmov 0.0   ;;  %vm627_vm0 = vmmov 0   ;;  %s765_s1 = inlined_call_operand.vmem [shape: bf16[576,128], index: 1, kind: input, shape index: {}]   ;;  %s766_s0 = inlined_call_operand.vmem [shape: bf16[2,576], index: 0, kind: input, shape index: {}]   ;;  %s767_s2 = inlined_call_operand.vmem [shape: f32[1,128], index: 2, kind: input, shape index: {}]   ;;  %s768_s3 = inlined_call_operand.vmem [shape: bf16[2,128], index: 3, kind: output, shape index: {}]  }
   0x1   :  { %v588_v0 = vld [vmem:[%s765_s1 + $0x40] sm:$0xff]   ;;  %v592_v4 = vld [vmem:[%s765_s1 + $0x48] sm:$0xff]   ;;  %v596_v8 = vld [vmem:[%s765_s1 + $0x50] sm:$0xff]   ;;  %v98_v22 = vunpack.c.l.s4 %v625_v21  ;;  %vm355_vm1 = vcmask 523264  }
   0x2   :  { %v589_v1 = vld [vmem:[%s765_s1] sm:$0xff]   ;;  %524 = vmatprep.subr.bf16.mxu0 %v588_v0  ;;  %v593_v5 = vld [vmem:[%s765_s1 + $0x8] sm:$0xff]   ;;  %v597_v9 = vld [vmem:[%s765_s1 + $0x10] sm:$0xff]   ;;  %v101_v29 = vshrl.u32 %v100_v23, 7 }
   0x3   :  { %v590_v2 = vld [vmem:[%s765_s1 + $0xc0] sm:$0xff]   ;;  %525 = vmatpush3.bf16.msra.mxu0 %v589_v1  ;;  %v594_v6 = vld [vmem:[%s765_s1 + $0xc8] sm:$0xff]   ;;  %v598_v10 = vld [vmem:[%s765_s1 + $0xd0] sm:$0xff]   ;;  %v99_v28 = vunpack.c.0.s8 %v98_v22 }
   0x4   :  { %v591_v3 = vld [vmem:[%s765_s1 + $0x80] sm:$0xff]   ;;  %546 = vmatprep.subr.bf16.mxu1 %v590_v2  ;;  %526 = vmatprep.subr.bf16.mxu0 %v592_v4  ;;  %v595_v7 = vld [vmem:[%s765_s1 + $0x88] sm:$0xff]   ;;  %v599_v11 = vld [vmem:[%s765_s1 + $0x90] sm:$0xff]  }
   0x5   :  { %547 = vmatpush3.bf16.msra.mxu1 %v591_v3  ;;  %v600_v12 = vld [vmem:[%s765_s1 + $0x58] sm:$0xff]   ;;  %v604_v16 = vld [vmem:[%s765_s1 + $0x60] sm:$0xff]   ;;  %v608_v20 = vld [vmem:[%s765_s1 + $0x68] sm:$0xff]   ;;  %v102_v34 = vsub.s32 %v99_v28, %v101_v29 }
   0x6   :  { %548 = vmatprep.subr.bf16.mxu1 %v594_v6  ;;  %v601_v13 = vld [vmem:[%s765_s1 + $0x18] sm:$0xff]   ;;  %v605_v17 = vld [vmem:[%s765_s1 + $0x20] sm:$0xff]   ;;  %v609_v24 = vld [vmem:[%s765_s1 + $0x28] sm:$0xff]  }
   0x7   :  { %527 = vmatpush3.bf16.msra.mxu0 %v593_v5  ;;  %v602_v14 = vld [vmem:[%s765_s1 + $0xd8] sm:$0xff]   ;;  %v606_v18 = vld [vmem:[%s765_s1 + $0xe0] sm:$0xff]   ;;  %v610_v25 = vld [vmem:[%s765_s1 + $0xe8] sm:$0xff]  }
   0x8   :  { %528 = vmatprep.subr.bf16.mxu0 %v596_v8  ;;  %v603_v15 = vld [vmem:[%s765_s1 + $0x98] sm:$0xff]   ;;  %v607_v19 = vld [vmem:[%s765_s1 + $0xa0] sm:$0xff]   ;;  %v611_v26 = vld [vmem:[%s765_s1 + $0xa8] sm:$0xff]  }
   0x9   :  { %549 = vmatpush3.bf16.msra.mxu1 %v595_v7  ;;  %v612_v27 = vld [vmem:[%s765_s1 + $0x70] sm:$0xff]   ;;  %v616_v33 = vld [vmem:[%s765_s1 + $0x78] sm:$0xff]   ;;  %v15_v37 = vld [vmem:[%s766_s0] sm:$0x1f] }
   0xa   :  { %550 = vmatprep.subr.bf16.mxu1 %v598_v10  ;;  %v613_v30 = vld [vmem:[%s765_s1 + $0x30] sm:$0xff]   ;;  %v617_v35 = vld [vmem:[%s765_s1 + $0x38] sm:$0xff]   ;;  %v103_v38 = vrot.slane %v15_v37, %v102_v34  ;;  %v621_v44 = vld [vmem:[%s765_s1 + $0x100] sm:$0xff]   ;;  %v96_v48 = vcombine.high %v15_v37, %v15_v37 }
   0xb   :  { %529 = vmatpush3.bf16.msra.mxu0 %v597_v9  ;;  %v614_v31 = vld [vmem:[%s765_s1 + $0xf0] sm:$0xff]   ;;  %v618_v36 = vld [vmem:[%s765_s1 + $0xf8] sm:$0xff]   ;;  %v622_v47 = vld [vmem:[%s765_s1 + $0x108] sm:$0xff]  }
   0xc   :  { %530 = vmatprep.subr.bf16.mxu0 %v600_v12  ;;  %v615_v32 = vld [vmem:[%s765_s1 + $0xb0] sm:$0xff]   ;;  %v620_v39 = vld [vmem:[%s765_s1 + $0xb8] sm:$0xff]   ;;  %v111_v41 = vcombine.high %v103_v38, %v103_v38  ;;  %v118_v42 = vrot.slane %v103_v38, %v102_v34  ;;  %v110_v50 = vrot.slane %v96_v48, %v102_v34  ;;  %v486_v54 = vld [vmem:[%s767_s2] ss:$0 sm:$0xff] }
   0xd   :  { %551 = vmatpush3.bf16.msra.mxu1 %v599_v11  ;;  %v623_v49 = vld [vmem:[%s765_s1 + $0x110] sm:$0xff]   ;;  %v624_v51 = vld [vmem:[%s765_s1 + $0x118] sm:$0xff]  }
   0xe   :  { %552 = vmatprep.subr.bf16.mxu1 %v602_v14  ;;  %v132_v43 = vrot.slane %v111_v41, %v102_v34  ;;  %v133_v45 = vcombine.high %v118_v42, %v118_v42  ;;  %v125_v52 = vrot.slane %v110_v50, %v102_v34 }
   0xf   :  { %531 = vmatpush3.bf16.msra.mxu0 %v601_v13 }
  0x10   :  { %532 = vmatprep.subr.bf16.mxu0 %v604_v16  ;;  %391 = vmatprep.mubr.bf16.mxu0 %v132_v43  ;;  %v134_v46 = vcombine.high %v132_v43, %v132_v43 }
  0x11   :  { %553 = vmatpush3.bf16.msra.mxu1 %v603_v15 }
  0x12   :  { %554 = vmatprep.subr.bf16.mxu1 %v606_v18  ;;  %431 = vmatprep.mubr.bf16.mxu1 %v134_v46 }
  0x13   :  { %533 = vmatpush3.bf16.msra.mxu0 %v605_v17 }
  0x14   :  { %534 = vmatprep.subr.bf16.mxu0 %v608_v20 }
  0x15   :  { %555 = vmatpush3.bf16.msra.mxu1 %v607_v19 }
  0x16   :  { %556 = vmatprep.subr.bf16.mxu1 %v610_v25 }
  0x17   :  { %535 = vmatpush3.bf16.msra.mxu0 %v609_v24 }
  0x18   :  { %536 = vmatprep.subr.bf16.mxu0 %v612_v27 }
  0x19   :  { %557 = vmatpush3.bf16.msra.mxu1 %v611_v26 }
  0x1a   :  { %558 = vmatprep.subr.bf16.mxu1 %v614_v31 }
  0x1b   :  { %537 = vmatpush3.bf16.msra.mxu0 %v613_v30 }
  0x1c   :  { %538 = vmatprep.subr.bf16.mxu0 %v616_v33 }
  0x1d   :  { %559 = vmatpush3.bf16.msra.mxu1 %v615_v32 }
  0x1e   :  { %560 = vmatprep.subr.bf16.mxu1 %v618_v36 }
  0x1f   :  { %539 = vmatpush3.bf16.msra.mxu0 %v617_v35 }
  0x20   :  { %573 = vmatprep.subr.bf16.mxu0 %v626_v40 }
  0x21   :  { %561 = vmatpush3.bf16.msra.mxu1 %v620_v39 }
  0x22   :  { %392 = vmatmul.mubr.bf16.vlgmr.msra.gmra.mrb[0].mxu0 %v118_v42 }
  0x23   :  { %574 = vmatpush3.bf16.msra.mxu0 %v621_v44  ;;  %581 = vmatprep.mubr.msk.bf16.mxu0 %vm627_vm0, %v626_v40 }
  0x24   :  { %432 = vmatmul.mubr.bf16.vlgmr.msra.gmra.mrb[0].mxu1 %v133_v45  ;;  %575 = vmatprep.subr.bf16.mxu0 %v626_v40 }
  0x27   :  { %576 = vmatpush3.bf16.msra.mxu0 %v622_v47 }
  0x28   :  { %577 = vmatprep.subr.bf16.mxu0 %v626_v40 }
  0x2b   :  { %578 = vmatpush3.bf16.msra.mxu0 %v623_v49 }
  0x2c   :  { %579 = vmatprep.subr.bf16.mxu0 %v626_v40 }
  0x2f   :  { %580 = vmatpush3.bf16.msra.mxu0 %v624_v51 }
  0x32   :  { %582 = vmatmul.mubr.msk.bf16.vlgmr.msra.gmra.mrb[4].mxu0 %vm355_vm1, %v125_v52 }
  0xf5   :  { %v540_v53 = vpop.f32.mrb[0].mxu0 }
  0xf6   :  { %v541_v55 = vpop.f32.mrb[1].mxu0 }
  0xf7   :  { %v542_v56 = vadd.f32 %v541_v55, %v540_v53  ;;  %v543_v57 = vpop.f32.mrb[2].mxu0  ;;  %v562_v58 = vpop.f32.mrb[0].mxu1 }
  0xf8   :  { %v544_v59 = vpop.f32.mrb[3].mxu0  ;;  %v563_v60 = vpop.f32.mrb[1].mxu1 }
  0xf9   :  { %v394_v61 = vadd.f32 %v542_v56, %v486_v54  ;;  %v564_v62 = vadd.f32 %v563_v60, %v562_v58  ;;  %v565_v63 = vpop.f32.mrb[2].mxu1 }
  0xfa   :  { %v566_v0 = vpop.f32.mrb[3].mxu1 }
  0xfb   :  { %v434_v1 = vadd.f32 %v564_v62, %v394_v61 }
 0x105   :  { %v473_v2 = vpop.f32.mrb[4].mxu0 }
 0x106   :  { %v474_v3 = vadd.f32 %v473_v2, %v434_v1  ;;  %v583_v4 = vpop.f32.mrb[5].mxu0 }
 0x107   :  { %v476_v5 = vpop.f32.mrb[6].mxu0 }
 0x108   :  { %v479_v6 = vmax.f32 %v474_v3, 0.0  ;;  %v584_v7 = vpop.f32.mrb[7].mxu0 }
 0x10a   :  { %v480_v8 = vpack.c.bf16 %v479_v6, %v479_v6 }
 0x10c   :  { %481 = vst [vmem:[%s768_s3] sm:$0x1] %v480_v8 }

</bundles_post_ra>
